<compile_context>
chip_gen: v7x
topology: tpu7x:2x2x1
jax: 0.10.0
libtpu: 0.0.40
codegen_flags: <defaults>
</compile_context>

<pallas_src>
import jax
import jax.numpy as jnp
from jax import lax
from jax.experimental import pallas as pl
from jax.experimental.pallas import tpu as pltpu

_DN = (((1,), (0,)), ((), ()))  # standard (M, K) x (K, N) contraction


def _hydra_lora_kernel(x_ref, w1t_ref, at_ref, bt_ref, o_ref, weff_ref):
    i = pl.program_id(1)  # inner token-tile index

    # Fold W_eff.T[:, j_tile] = W1_e.T[:, j_tile] + A_e.T @ B.T[:, j_tile]
    # once per output-column tile (outer grid axis); reuse for every token tile.
    @pl.when(i == 0)
    def _():
        fold = lax.dot_general(at_ref[...], bt_ref[...], _DN,
                               preferred_element_type=jnp.float32)        # (R, tn)
        # bf16 add: avoids an (H, tn) f32 temporary of the W1 tile; the folded
        # weight is stored in bf16 for the MXU anyway.
        weff_ref[...] = w1t_ref[...] + fold.astype(weff_ref.dtype)

    acc = lax.dot_general(x_ref[...], weff_ref[...], _DN,
                          preferred_element_type=jnp.float32)             # (tm, tn)
    o_ref[...] = acc.astype(o_ref.dtype)


def _tpu_vmem_and_cores():
    """Best-effort generation query; falls back to a v7x-safe budget."""
    vmem_cap, num_cores = 64 * 2**20, 1
    try:
        info = pltpu.get_tpu_info()
        vmem_cap = int(getattr(info, "vmem_capacity_bytes", vmem_cap))
        num_cores = int(getattr(info, "num_cores",
                                getattr(info, "tensorcores_per_chip", 1)))
    except Exception:  # interpret mode / unknown chip: keep safe defaults
        pass
    return max(vmem_cap, 32 * 2**20), max(1, num_cores)


def _plan_bytes(tm, tn, H, F, R, cbytes, obytes):
    """VMEM footprint: double-buffered pipeline operands + resident scratch."""
    return (2 * tm * H * cbytes        # x tile
            + 2 * H * tn * cbytes      # W1_e.T tile
            + 2 * R * F * cbytes       # A_e.T (grid-invariant, DMA'd once, but
                                       #        default double-buffered -> 2x)
            + 2 * H * tn * cbytes      # B.T tile
            + 2 * tm * tn * obytes     # output tile
            + H * tn * cbytes)         # folded-weight scratch (single copy)


def _pick_tiles(M, H, F, R, cbytes, obytes, vmem_cap, num_cores):
    budget = (vmem_cap * 3) // 4       # headroom for compiler-internal scratch
    tm_cands = [t for t in (512, 256, 128, 64, 32, 16, 8) if t <= M and M % t == 0]
    tm_cands = tm_cands or [M]
    tn_cands = [t for t in (1024, 512, 256, 128) if t <= F and F % t == 0]
    tn_cands = tn_cands or [F]

    tm, tn, found = tm_cands[-1], tn_cands[-1], False
    for tn_c in tn_cands:              # tn first: it sets x-side arithmetic intensity
        for tm_c in tm_cands:
            if _plan_bytes(tm_c, tn_c, H, F, R, cbytes, obytes) <= budget:
                tm, tn, found = tm_c, tn_c, True
                break
        if found:
            break
    if _plan_bytes(tm, tn, H, F, R, cbytes, obytes) > budget:
        raise ValueError(
            "HydraLora tile plan does not fit the VMEM budget (likely the "
            "double-buffered full A_e.T at large H); see Buffered(1)/wrapper-fold "
            "TODO at the top of this file.")

    # v7x megacore balance: keep the outer (parallel) F-tile count a multiple of
    # the TensorCore count, but never trade tn below 256 (roofline knee).
    if num_cores > 1 and (F // tn) % num_cores != 0:
        for tn_c in tn_cands:
            if tn_c <= tn and tn_c >= 256 and (F // tn_c) % num_cores == 0:
                tn = tn_c
                break
    return tm, tn, _plan_bytes(tm, tn, H, F, R, cbytes, obytes)


def hydra_lora_forward(x, w1, lora_a, lora_b, expert_idx, *,
                       moe_num_experts, ffn_hidden_size, hidden_size, rank,
                       compute_dtype=jnp.bfloat16, out_dtype=None):
    E, F, H, R = moe_num_experts, ffn_hidden_size, hidden_size, rank
    B, T, C = x.shape
    assert C == H
    # Shape constraints implied by the reference forward's matmul chain.
    assert R == H and F == H, "reference forward requires rank == hidden == ffn_hidden"
    M = B * T
    out_dtype = x.dtype if out_dtype is None else out_dtype

    cbytes = jnp.dtype(compute_dtype).itemsize
    obytes = jnp.dtype(out_dtype).itemsize
    vmem_cap, num_cores = _tpu_vmem_and_cores()
    tm, tn, plan = _pick_tiles(M, H, F, R, cbytes, obytes, vmem_cap, num_cores)
    assert M % tm == 0 and F % tn == 0, (M, tm, F, tn)
    assert tn % 128 == 0 or tn == F, "output tile must stay lane-dense"

    # One-time HBM-side layout prep (XLA, outside the kernel).  The selected
    # expert is sliced FIRST so only that expert's weights get transposed/cast
    # (1/E of the prep traffic of transposing the full parameter).
    w1_e = w1.reshape(E, F, H)[expert_idx]               # (F, H)
    a_e = lora_a.reshape(E, F, R)[expert_idx]            # (F, R)
    x2 = x.reshape(M, H).astype(compute_dtype)           # (M, H)
    w1t = w1_e.T.astype(compute_dtype)                   # (H, F)
    at = a_e.T.astype(compute_dtype)                     # (R, F)
    bt = lora_b.T.astype(compute_dtype)                  # (H, R)

    vmem_limit = int(min(vmem_cap - (4 << 20), max(plan + (8 << 20), 32 << 20)))

    cost = pl.CostEstimate(
        flops=int(2 * M * H * F + 2 * R * H * F),         # main matmul + fold
        transcendentals=0,
        bytes_accessed=int((F // tn) * M * H * cbytes     # x re-streamed per F-tile
                           + H * F * cbytes               # W1_e.T
                           + R * F * cbytes               # A_e.T (fetched once)
                           + H * R * cbytes               # B.T
                           + M * F * obytes),             # output
    )

    out = pl.pallas_call(
        _hydra_lora_kernel,
        out_shape=jax.ShapeDtypeStruct((M, F), out_dtype),
        grid_spec=pltpu.PrefetchScalarGridSpec(
            num_scalar_prefetch=0,
            # F-tiles outer, token tiles inner: weight tiles are DMA'd once per
            # F-tile (index_map constant along the inner axis) while x re-streams.
            grid=(F // tn, M // tm),
            in_specs=[
                pl.BlockSpec((tm, H), lambda j, i: (i, 0)),   # x
                pl.BlockSpec((H, tn), lambda j, i: (0, j)),   # W1_e.T
                pl.BlockSpec((R, F), lambda j, i: (0, 0)),    # A_e.T (grid-invariant)
                # Slicing B.T's second dim (size R) with the F-tile index is only
                # valid because R == F (asserted above).
                pl.BlockSpec((H, tn), lambda j, i: (0, j)),   # B.T
            ],
            out_specs=pl.BlockSpec((tm, tn), lambda j, i: (i, j)),
            scratch_shapes=[pltpu.VMEM((H, tn), compute_dtype)],   # folded weight
        ),
        compiler_params=pltpu.CompilerParams(
            # Inner token axis reuses the folded-weight scratch -> "arbitrary";
            # outer F axis is independent -> "parallel" (megacore sharding).
            dimension_semantics=("parallel", "arbitrary"),
            vmem_limit_bytes=vmem_limit,
        ),
        cost_estimate=cost,
    )(x2, w1t, at, bt)
    return out.reshape(B, T, F)


def hydra_lora_ref(x, w1, lora_a, lora_b, expert_idx, *, E, F, H, R):
    """Pure-JAX f32 mirror of the PyTorch forward (lora_b shared, see TODO)."""
    w1_e = w1.reshape(E, F, H)[expert_idx]
    a_e = lora_a.reshape(E, F, R)[expert_idx]
    b_e = lora_b
    wx = x @ w1_e.T
    lora = (x @ a_e.T) @ b_e.T
    return wx + lora


if __name__ == "__main__":
    # Small, kernel-friendly shapes (reference chain requires F == H == R).
    E = 4            # moe_num_experts
    H = F = R = 256  # hidden_size == ffn_hidden_size == rank
    B, T = 2, 512    # M = 1024 -> multiple token tiles (exercises scratch reuse)
    expert_idx = 2

    key = jax.random.PRNGKey(0)
    kx, kw, ka, kb = jax.random.split(key, 4)
    x = jax.random.normal(kx, (B, T, H), dtype=jnp.float32)
    w1 = jax.random.normal(kw, (E * F, H), dtype=jnp.float32) * 0.02
    lora_a = jax.random.normal(ka, (E * F, R), dtype=jnp.float32) * 0.02
    lora_b = jax.random.normal(kb, (R, H), dtype=jnp.float32) * 0.02

    out = hydra_lora_forward(
        x, w1, lora_a, lora_b, expert_idx,
        moe_num_experts=E, ffn_hidden_size=F, hidden_size=H, rank=R)
    out = jax.block_until_ready(out)

    ref = hydra_lora_ref(x, w1, lora_a, lora_b, expert_idx, E=E, F=F, H=H, R=R)
    assert out.shape == (B, T, F), out.shape
    # bf16 MXU inputs with f32 accumulation -> loosened tolerance vs f32 reference.
    err = float(jnp.max(jnp.abs(out - ref)))
    assert jnp.allclose(out, ref, rtol=2e-2, atol=2e-2), f"mismatch, max abs err {err}"

    print("KERNEL_OK")
</pallas_src>

<mosaic_0001>
module attributes {stable_mosaic.version = 11 : i64} {
  func.func @_hydra_lora_kernel(%arg0: i32, %arg1: i32, %arg2: memref<512x256xbf16, #tpu.memory_space<vmem>>, %arg3: memref<256x256xbf16, #tpu.memory_space<vmem>>, %arg4: memref<256x256xbf16, #tpu.memory_space<vmem>>, %arg5: memref<256x256xbf16, #tpu.memory_space<vmem>>, %arg6: memref<512x256xf32, #tpu.memory_space<vmem>>, %arg7: memref<256x256xbf16, #tpu.memory_space<vmem>>) attributes {dimension_semantics = [#tpu.dimension_semantics<parallel>, #tpu.dimension_semantics<arbitrary>], iteration_bounds = array<i64: 1, 2>, scalar_prefetch = 0 : i64, scratch_operands = 1 : i64, tpu.core_type = #tpu.core_type<tc>, window_params = [{transform_indices = @transform_0, window_bounds = array<i64: 512, 256>}, {transform_indices = @transform_1, window_bounds = array<i64: 256, 256>}, {pipeline_mode = #tpu.pipeline_mode<synchronous>, transform_indices = @transform_2, window_bounds = array<i64: 256, 256>}, {transform_indices = @transform_3, window_bounds = array<i64: 256, 256>}, {transform_indices = @transform_4, window_bounds = array<i64: 512, 256>}]} {
    %c0_i32 = arith.constant 0 : i32
    %0 = arith.cmpi eq, %arg1, %c0_i32 : i32
    %1 = arith.extui %0 : i1 to i32
    %c0_i32_0 = arith.constant 0 : i32
    %2 = arith.cmpi ne, %1, %c0_i32_0 : i32
    scf.if %2 {
      %c0_6 = arith.constant 0 : index
      %c0_7 = arith.constant 0 : index
      %7 = vector.load %arg4[%c0_6, %c0_7] : memref<256x256xbf16, #tpu.memory_space<vmem>>, vector<256x256xbf16>
      %c0_8 = arith.constant 0 : index
      %c0_9 = arith.constant 0 : index
      %8 = vector.load %arg5[%c0_8, %c0_9] : memref<256x256xbf16, #tpu.memory_space<vmem>>, vector<256x256xbf16>
      %cst_10 = arith.constant dense<0.000000e+00> : vector<256x256xf32>
      %9 = tpu.matmul %7, %8, %cst_10 {dimension_numbers = #tpu.dot_dimension_numbers<[1], [0], [0], [1], [0, 0, 1, 1], [], []>} : vector<256x256xbf16>, vector<256x256xbf16>, vector<256x256xf32> -> vector<256x256xf32>
      %c0_11 = arith.constant 0 : index
      %c0_12 = arith.constant 0 : index
      %10 = vector.load %arg3[%c0_11, %c0_12] : memref<256x256xbf16, #tpu.memory_space<vmem>>, vector<256x256xbf16>
      %11 = arith.truncf %9 : vector<256x256xf32> to vector<256x256xbf16>
      %12 = arith.addf %10, %11 : vector<256x256xbf16>
      %c0_13 = arith.constant 0 : index
      %c0_14 = arith.constant 0 : index
      %13 = vector.load %arg7[%c0_13, %c0_14] : memref<256x256xbf16, #tpu.memory_space<vmem>>, vector<256x256xbf16>
      tpu.vector_store %arg7[%c0_13, %c0_14], %12 {strides = array<i32>} : memref<256x256xbf16, #tpu.memory_space<vmem>>, vector<256x256xbf16>,
    } else {
    }
    %c0 = arith.constant 0 : index
    %c0_1 = arith.constant 0 : index
    %3 = vector.load %arg2[%c0, %c0_1] : memref<512x256xbf16, #tpu.memory_space<vmem>>, vector<512x256xbf16>
    %c0_2 = arith.constant 0 : index
    %c0_3 = arith.constant 0 : index
    %4 = vector.load %arg7[%c0_2, %c0_3] : memref<256x256xbf16, #tpu.memory_space<vmem>>, vector<256x256xbf16>
    %cst = arith.constant dense<0.000000e+00> : vector<512x256xf32>
    %5 = tpu.matmul %3, %4, %cst {dimension_numbers = #tpu.dot_dimension_numbers<[1], [0], [0], [1], [0, 0, 1, 1], [], []>} : vector<512x256xbf16>, vector<256x256xbf16>, vector<512x256xf32> -> vector<512x256xf32>
    %c0_4 = arith.constant 0 : index
    %c0_5 = arith.constant 0 : index
    %6 = vector.load %arg6[%c0_4, %c0_5] : memref<512x256xf32, #tpu.memory_space<vmem>>, vector<512x256xf32>
    tpu.vector_store %arg6[%c0_4, %c0_5], %5 {strides = array<i32>} : memref<512x256xf32, #tpu.memory_space<vmem>>, vector<512x256xf32>,
    return
  }
  func.func @transform_0(%arg0: i32, %arg1: i32) -> (i32, i32) {
    %c0_i32 = arith.constant 0 : i32
    %c0_i32_0 = arith.constant 0 : i32
    return %arg1, %c0_i32 : i32, i32
  }
  func.func @transform_1(%arg0: i32, %arg1: i32) -> (i32, i32) {
    %c0_i32 = arith.constant 0 : i32
    %c0_i32_0 = arith.constant 0 : i32
    return %c0_i32, %arg0 : i32, i32
  }
  func.func @transform_2(%arg0: i32, %arg1: i32) -> (i32, i32) {
    %c0_i32 = arith.constant 0 : i32
    %c0_i32_0 = arith.constant 0 : i32
    %c0_i32_1 = arith.constant 0 : i32
    return %c0_i32, %c0_i32_0 : i32, i32
  }
  func.func @transform_3(%arg0: i32, %arg1: i32) -> (i32, i32) {
    %c0_i32 = arith.constant 0 : i32
    %c0_i32_0 = arith.constant 0 : i32
    return %c0_i32, %arg0 : i32, i32
  }
  func.func @transform_4(%arg0: i32, %arg1: i32) -> (i32, i32) {
    %c0_i32 = arith.constant 0 : i32
    return %arg1, %arg0 : i32, i32
  }
}

</mosaic_0001>

<bundles_post_ra>
// kernel: tpu_custom_call.1
= control target key start
LH: loop header
LB: loop body
LE: loop exit
PB: predicated region body
PF: predicated region fallthrough
CT: control target
= control target key end

     0   :  { %9 = vsyncpa [#allocation4], 0  ;;  %s3692_s0 = inlined_call_operand.hbm [shape: bf16[1024,256], index: 0, kind: input, shape index: {}]   ;;  %s3693_s1 = inlined_call_operand.hbm [shape: bf16[256,256], index: 1, kind: input, shape index: {}]   ;;  %s3694_s2 = inlined_call_operand.hbm [shape: bf16[256,256], index: 2, kind: input, shape index: {}]   ;;  %s3695_s3 = inlined_call_operand.hbm [shape: bf16[256,256], index: 3, kind: input, shape index: {}]   ;;  %s3696_s4 = inlined_call_operand.hbm [shape: f32[1024,256], index: 4, kind: output, shape index: {}]  }
   0x1   :  { %11 = vsyncpa [#allocation4 + $0x1], 0 }
   0x2   :  { %12 = vsyncpa [#allocation7], 0 }
   0x3   :  { %13 = vsyncpa [#allocation10], 0 }
   0x4   :  { %14 = vsyncpa [#allocation5], 0 }
   0x5   :  { %16 = vsyncpa [#allocation5 + $0x1], 0  ;;  %s3201_s15 = smov 0   ;;  %s3203_s16 = smov 0  }
   0x6   :  { %s3205_s17 = smov 0   ;;  %s3207_s18 = smov 0  }
   0x7   :  { %s3209_s19 = smov 0   ;;  %s3211_s20 = smov 0  }
   0x8 LB: > { %s2356_s21 = sadd.s32 4294967295, %s3165_s20   ;;  %s2357_s22 = sadd.s32 4294967294, %s3165_s20   ;;  %s3165_s20 = sphi %s3211_s20, %s22_s20   ;;  %s3161_s19 = sphi %s3209_s19, %s3723_s19   ;;  %s3157_s18 = sphi %s3207_s18, %s3722_s18   ;;  %s3153_s17 = sphi %s3205_s17, %s3721_s17   ;;  %s3149_s16 = sphi %s3203_s16, %s3720_s16   ;;  %s3145_s15 = sphi %s3201_s15, %s3719_s15  }
   0x9   : > { %p54_p0 = scmp.ne.s32.totalorder %s3149_s16, %s3145_s15  ;;  %p3235_p1 = scmp.eq.s32.totalorder %s2356_s21, 0 }
   0xa   : > { %p3239_p2 = scmp.eq.s32.totalorder %s2356_s21, 1  ;;  %p159_p3 = scmp.eq.s32.totalorder %s2357_s22, 1 }
   0xb   : > { %s3702_s23 = scalar_select %p3235_p1, 1, 0 }
   0xc   : > { %s3703_s24 = scalar_select %p3239_p2, 1, 0 }
   0xd   : > { %p3245_p4 = por %p3235_p1, %p54_p0  ;;  %p2358_p5 = scmp.ge.s32.totalorder %s3165_s20, 1 }
   0xe   : > { %p3250_p6 = por %p159_p3, %p54_p0  ;;  %p166_p7 = scmp.lt.s32.totalorder %s3165_s20, 3 }
   0xf   : > { %s3704_s25 = scalar_select %p3245_p4, 1, 0 }
  0x10   : > { %s3705_s26 = scalar_select %p3250_p6, 1, 0 }
  0x11   : > { %p3255_p8 = pnand %p2358_p5, %p166_p7  ;;  %s3167_s28 = smov [#allocation6]  }
  0x12   : > { %3706 = sst [smem:[#allocation16_spill]] %s3705_s26  ;;  %s181_s29 = sshll.u32 %s3167_s28, 4  ;;  %s3259_s29 = int_to_ptr.vmem [resolvable:$true] %s181_s29 }
  0x13   : > { %s3707_s27 = scalar_select %p3255_p8, 1, 0 }
  0x14   : > { %p2688_p9 = pneg %p3255_p8  ;;  %s3168_s5 = smov [#allocation8]  }
  0x15   : > { %s194_s6 = sshll.u32 %s3168_s5, 4  ;;  %s3169_s7 = smov [#allocation9]   ;;  %s3270_s6 = int_to_ptr.vmem [resolvable:$true] %s194_s6 }
  0x16   : > { %p3266_p11 = pnand %p2688_p9, %p3235_p1  ;;  %s3272_s8 = sshll.u32 %s3169_s7, 4  ;;  %s211_s8 = int_to_ptr.vmem [resolvable:$true] %s3272_s8 }
  0x17   : > { %s2961_s11 = scalar_lea.hbm %s3693_s1, 4096 }
  0x18   : > { %p2962_p12 = scmp.ne.s32.totalorder %s3693_s1, %s2961_s11  ;;  %p3282_p13 = pneg %p3266_p11 }
  0x19   : > { %p2968_p5 = scmp.lt.u32.totalorder %s2961_s11, %s3693_s1 }
  0x1a   : > { %p2964_p0 = pnand %p3282_p13, %p2962_p12 }
  0x1c   : > { %p2965_p3 = pneg %p2964_p0 }
  0x1e   : > { %p2970_p7 = pnand %p2968_p5, %p2965_p3 }
  0x20   : > { %2973 = shalt.err (!%p2970_p7)
}
  0x21   : > { %s2974_s28 = scalar_lea.vmem %s3259_s29, 4096  ;;  %p2982_p1 = scmp.lt.s32.totalorder %s3259_s29, %s3259_s29 }
  0x22   : > { %p2975_p9 = scmp.ne.s32.totalorder %s3259_s29, %s2974_s28  ;;  %p2983_p4 = scmp.lt.s32.totalorder %s2974_s28, %s2974_s28 }
  0x24   : > { %p2977_p10 = pnand %p2975_p9, %p3282_p13  ;;  %p2984_p12 = por %p2983_p4, %p2982_p1 }
  0x26   : > { %p2978_p6 = pneg %p2977_p10 }
  0x28   : > { %p2985_p0 = pnand %p2984_p12, %p2978_p6 }
  0x2a   : > { %2988 = shalt.err (!%p2985_p0)
}
  0x2b   : > { %s3170_s5 = smov 128   ;;  %s3171_s7 = smov 8  }
  0x2c   : > { %2691 = dma.hbm_to_vmem [thread:$0]  (!%p3266_p11), %s3693_s1, 4096, %s3259_s29, [#allocation7], %s3170_s5, %s3170_s5, %s3171_s7  }
  0x2d   : > { %s2989_s13 = scalar_lea.hbm %s3694_s2, 4096 }
  0x2e   : > { %p2990_p1 = scmp.ne.s32.totalorder %s3694_s2, %s2989_s13  ;;  %p2996_p10 = scmp.lt.u32.totalorder %s2989_s13, %s3694_s2 }
  0x30   : > { %p2992_p4 = pnand %p2990_p1, %p3282_p13 }
  0x32   : > { %p2993_p6 = pneg %p2992_p4 }
  0x34   : > { %p2998_p3 = pnand %p2996_p10, %p2993_p6 }
  0x36   : > { %3001 = shalt.err (!%p2998_p3)
}
  0x37   : > { %s3002_s29 = scalar_lea.vmem %s3270_s6, 4096  ;;  %p3010_p12 = scmp.lt.s32.totalorder %s3270_s6, %s3270_s6 }
  0x38   : > { %p3003_p5 = scmp.ne.s32.totalorder %s3270_s6, %s3002_s29  ;;  %p3011_p0 = scmp.lt.s32.totalorder %s3002_s29, %s3002_s29 }
  0x3a   : > { %p3005_p7 = pnand %p3003_p5, %p3282_p13  ;;  %p3012_p1 = por %p3011_p0, %p3010_p12 }
  0x3c   : > { %p3006_p9 = pneg %p3005_p7 }
  0x3e   : > { %p3013_p4 = pnand %p3012_p1, %p3006_p9 }
  0x40   : > { %3016 = shalt.err (!%p3013_p4)
}
  0x41   : > { %2694 = dma.hbm_to_vmem [thread:$0]  (!%p3266_p11), %s3694_s2, 4096, %s3270_s6, [#allocation7], %s3170_s5, %s3170_s5, %s3171_s7  }
  0x42   : > { %s3017_s12 = scalar_lea.hbm %s3695_s3, 4096 }
  0x43   : > { %p3018_p6 = scmp.ne.s32.totalorder %s3695_s3, %s3017_s12  ;;  %p3024_p5 = scmp.lt.u32.totalorder %s3017_s12, %s3695_s3 }
  0x45   : > { %p3020_p10 = pnand %p3018_p6, %p3282_p13 }
  0x47   : > { %p3021_p3 = pneg %p3020_p10 }
  0x49   : > { %p3026_p7 = pnand %p3024_p5, %p3021_p3 }
  0x4b   : > { %3029 = shalt.err (!%p3026_p7)
}
  0x4c   : > { %s3030_s29 = scalar_lea.vmem %s211_s8, 4096  ;;  %p3038_p1 = scmp.lt.s32.totalorder %s211_s8, %s211_s8 }
  0x4d   : > { %p3031_p9 = scmp.ne.s32.totalorder %s211_s8, %s3030_s29  ;;  %p3039_p4 = scmp.lt.s32.totalorder %s3030_s29, %s3030_s29 }
  0x4f   : > { %p3033_p12 = pnand %p3031_p9, %p3282_p13  ;;  %p3040_p8 = por %p3039_p4, %p3038_p1 }
  0x51   : > { %p3034_p0 = pneg %p3033_p12 }
  0x53   : > { %p3041_p2 = pnand %p3040_p8, %p3034_p0 }
  0x55   : > { %3044 = shalt.err (!%p3041_p2)
}
  0x56   : > { %2697 = dma.hbm_to_vmem [thread:$0]  (!%p3266_p11), %s3695_s3, 4096, %s211_s8, [#allocation10], %s3170_s5, %s3170_s5, %s3171_s7  }
  0x57   : > { %s41_s14 = sadd.s32 1, %s3153_s17  ;;  %s31_s30 = sadd.s32 1, %s3161_s19 }
  0x58   : > { %p48_p2 = scmp.ne.s32.totalorder %s3153_s17, %s3149_s16  ;;  %p32_p8 = scmp.ge.s32.totalorder %s31_s30, 2 }
  0x59   : > { %p49_p13 = scmp.eq.s32.totalorder %s3165_s20, 0  ;;  %p3710_p6 = scmp.ne.s32.totalorder %s3703_s24, 0 }
  0x5a   : > { %p2709_p3 = scmp.lt.s32.totalorder %s3165_s20, 2  ;;  %s3725_s30 = smov (%p32_p8, %s31_s30), 0 }
  0x5b   : > { %p3361_p10 = por %p3710_p6, %p48_p2  ;;  %p50_p5 = por %p49_p13, %p48_p2 }
  0x5c   : > { %s224_s10 = sand.u32 1, %s3153_s17   ;;  %s38_s11 = ssub.s32 %s3161_s19, %s3725_s30 }
  0x5d   : > { %p39_p7 = scmp.eq.s32.totalorder %s38_s11, 0  ;;  %s2363_s8 = sshll.u32 %s224_s10, 9 }
  0x5e   : > { %s2573_s12 = sshll.u32 %s3161_s19, 13  ;;  %s228_s28 = scalar_lea.vmem [#allocation3], %s2363_s8 }
  0x5f   : > { %s3373_s13 = scalar_select %p39_p7, %s3153_s17, %s41_s14  }
  0x60   : > { %s3378_s24 = scalar_lea.hbm %s3692_s0, %s2573_s12  ;;  %s236_s29 = sshll.u32 %s228_s28, 4  ;;  %s3380_s29 = int_to_ptr.vmem [resolvable:$true] %s236_s29 }
  0x61   : > { %p3384_p11 = pnand %p2709_p3, %p50_p5  ;;  %s3388_s26 = scalar_lea.sflag [#allocation4], %s224_s10 }
  0x62   : > { %s3045_s14 = scalar_lea.hbm %s3378_s24, 8192  ;;  %s3050_s12 = scalar_lea.hbm %s3692_s0, 16384 }
  0x63   : > { %p3046_p9 = scmp.ne.s32.totalorder %s3378_s24, %s3045_s14  ;;  %p3047_p12 = pneg %p3384_p11 }
  0x64   : > { %p3051_p4 = scmp.lt.u32.totalorder %s3378_s24, %s3692_s0  ;;  %p3052_p2 = scmp.lt.u32.totalorder %s3050_s12, %s3045_s14 }
  0x65   : > { %p3048_p0 = pnand %p3047_p12, %p3046_p9  ;;  %p3054_p13 = scmp.lt.u32.totalorder %s3045_s14, %s3378_s24 }
  0x66   : > { %p3053_p8 = por %p3052_p2, %p3051_p4 }
  0x67   : > { %p3049_p1 = pneg %p3048_p0 }
  0x68   : > { %p3055_p6 = por %p3054_p13, %p3053_p8 }
  0x6a   : > { %p3056_p3 = pnand %p3055_p6, %p3049_p1 }
  0x6c   : > { %3059 = shalt.err (!%p3056_p3)
}
  0x6d   : > { %s3060_s10 = scalar_lea.vmem %s3380_s29, 8192  ;;  %s3172_s28 = smov [#allocation3]  }
  0x6e   : > { %p3061_p5 = scmp.ne.s32.totalorder %s3380_s29, %s3060_s10  ;;  %s3065_s11 = sshll.u32 %s3172_s28, 4  ;;  %s3066_s11 = int_to_ptr.vmem [resolvable:$false] %s3065_s11 }
  0x6f   : > { %s3067_s8 = scalar_lea.vmem %s3066_s11, 16384  ;;  %p3068_p0 = scmp.lt.s32.totalorder %s3380_s29, %s3066_s11 }
  0x70   : > { %p3063_p7 = pnand %p3061_p5, %p3047_p12  ;;  %p3069_p4 = scmp.lt.s32.totalorder %s3067_s8, %s3060_s10 }
  0x72   : > { %p3064_p9 = pneg %p3063_p7  ;;  %p3070_p2 = por %p3069_p4, %p3068_p0 }
  0x74   : > { %p3071_p8 = pnand %p3070_p2, %p3064_p9 }
  0x76   : > { %3074 = shalt.err (!%p3071_p8)
}
  0x77   : > { %2701 = dma.hbm_to_vmem [thread:$0]  (!%p3384_p11), %s3378_s24, 8192, %s3380_s29, %s3388_s26, %s3170_s5, %s3170_s5, %s3171_s7  }
  0x78   : > { %p3713_p12 = scmp.ne.s32.totalorder %s3707_s27, 0 }
  0x79   : > { %s3422_s14 = sand.u32 (!%p3713_p12), 1, %s3149_s16   ;;  %p3714_p1 = scmp.ne.s32.totalorder (!%p3713_p12), %s3704_s25, 0 }
  0x7a   : > { %248 = sbr.rel (%p3713_p12) target bundleno = 895 (0x37f), region = 36  ;;  %s2368_s12 = sshll.u32 (!%p3713_p12), %s3422_s14, 9 }
  0x7b   : > { %s251_s21 = scalar_lea.sflag (!%p3713_p12), [#allocation4], %s3422_s14  ;;  %s3426_s22 = scalar_lea.vmem (!%p3713_p12), [#allocation3], %s2368_s12 }
  0x81   : > { %3128 = dma.done.wait (%p3714_p1), %s251_s21, 8192  }
  0x82   : > { %3130 = vsyncadd (%p3714_p1), %s251_s21, 4294959104  ;;  %p3715_p11 = scmp.ne.s32.totalorder %s3702_s23, 0 }
  0x84   : > { %3132 = dma.done.wait (%p3715_p11), [#allocation7], 8192  }
  0x85   : > { %3134 = vsyncadd (%p3715_p11), [#allocation7], 4294959104 }
  0x86   : > { %3136 = dma.done.wait (%p3715_p11), [#allocation10], 4096  }
  0x87   : > { %3138 = vsyncadd (%p3715_p11), [#allocation10], 4294963200  ;;  %s2372_s27 = sshll.u32 %s3422_s14, 10  ;;  %p2373_p13 = scmp.ne.s32.totalorder %s3157_s18, 0 }
  0x88   : > { %s3441_s5 = scalar_lea.vmem [#allocation11], %s2372_s27  ;;  %v2769_v0 = vld [vmem:[#allocation9 + $0x4] ss:$8 sps:$4 sm:$0xff] (!%p2373_p13)   ;;  %v2771_v1 = vld [vmem:[#allocation9] ss:$8 sps:$4 sm:$0xff] (!%p2373_p13)  }
  0x89   : > { %299 = sbr.rel (%p2373_p13) target bundleno = 480 (0x1e0), region = 56  ;;  %684 = vmatprep.subr.bf16.mxu0 (!%p2373_p13), %v2769_v0  ;;  %2608 = vmatprep.subr.bf16.mxu1 (!%p2373_p13), %v2769_v0  ;;  %v2772_v2 = vld [vmem:[#allocation9 + $0x14] ss:$8 sps:$4 sm:$0xff] (!%p2373_p13)   ;;  %v2774_v3 = vld [vmem:[#allocation9 + $0x10] ss:$8 sps:$4 sm:$0xff] (!%p2373_p13)  }
  0x8a   : > { %685 = vmatpush1.bf16.msra.mxu0 (!%p2373_p13), %v2771_v1  ;;  %2624 = vmatpush1.bf16.msra.mxu1 (!%p2373_p13), %v2771_v1  ;;  %v2775_v4 = vld [vmem:[#allocation9 + $0x24] ss:$8 sps:$4 sm:$0xff] (!%p2373_p13)   ;;  %v2777_v5 = vld [vmem:[#allocation9 + $0x20] ss:$8 sps:$4 sm:$0xff] (!%p2373_p13)   ;;  %v2778_v6 = vld [vmem:[#allocation9 + $0x34] ss:$8 sps:$4 sm:$0xff] (!%p2373_p13)  }
  0x8b   : > { %686 = vmatprep.subr.bf16.mxu0 (!%p2373_p13), %v2772_v2  ;;  %2609 = vmatprep.subr.bf16.mxu1 (!%p2373_p13), %v2772_v2  ;;  %v2780_v7 = vld [vmem:[#allocation9 + $0x30] ss:$8 sps:$4 sm:$0xff] (!%p2373_p13)   ;;  %v2781_v8 = vld [vmem:[#allocation9 + $0x44] ss:$8 sps:$4 sm:$0xff] (!%p2373_p13)   ;;  %v2783_v9 = vld [vmem:[#allocation9 + $0x40] ss:$8 sps:$4 sm:$0xff] (!%p2373_p13)  }
  0x8c   : > { %v2784_v10 = vld [vmem:[#allocation9 + $0x54] ss:$8 sps:$4 sm:$0xff] (!%p2373_p13)   ;;  %v2786_v11 = vld [vmem:[#allocation9 + $0x50] ss:$8 sps:$4 sm:$0xff] (!%p2373_p13)   ;;  %v2787_v12 = vld [vmem:[#allocation9 + $0x64] ss:$8 sps:$4 sm:$0xff] (!%p2373_p13)  }
  0x8d   : > { %v2819_v13 = vld [vmem:[#allocation8 + $0x4] ss:$8 sps:$4 sm:$0xff] (!%p2373_p13)   ;;  %v2789_v14 = vld [vmem:[#allocation9 + $0x60] ss:$8 sps:$4 sm:$0xff] (!%p2373_p13)   ;;  %v2790_v16 = vld [vmem:[#allocation9 + $0x74] ss:$8 sps:$4 sm:$0xff] (!%p2373_p13)  }
  0x8e   : > { %687 = vmatpush1.bf16.msra.mxu0 (!%p2373_p13), %v2774_v3  ;;  %2625 = vmatpush1.bf16.msra.mxu1 (!%p2373_p13), %v2774_v3  ;;  %v2822_v15 = vld [vmem:[#allocation8 + $0x84] ss:$8 sps:$4 sm:$0xff] (!%p2373_p13)   ;;  %v2792_v17 = vld [vmem:[#allocation9 + $0x70] ss:$8 sps:$4 sm:$0xff] (!%p2373_p13)   ;;  %v2795_v19 = vld [vmem:[#allocation9 + $0x80] ss:$8 sps:$4 sm:$0xff] (!%p2373_p13)  }
  0x8f   : > { %688 = vmatprep.subr.bf16.mxu0 (!%p2373_p13), %v2775_v4  ;;  %2610 = vmatprep.subr.bf16.mxu1 (!%p2373_p13), %v2775_v4  ;;  %v2793_v18 = vld [vmem:[#allocation9 + $0x84] ss:$8 sps:$4 sm:$0xff] (!%p2373_p13)   ;;  %v2796_v20 = vld [vmem:[#allocation9 + $0x94] ss:$8 sps:$4 sm:$0xff] (!%p2373_p13)   ;;  %v2798_v21 = vld [vmem:[#allocation9 + $0x90] ss:$8 sps:$4 sm:$0xff] (!%p2373_p13)  }
  0x90   : > { %716 = vmatprep.mubr.bf16.mxu0 %v2819_v13  ;;  %796 = vmatprep.mubr.bf16.mxu1 %v2822_v15  ;;  %v2799_v22 = vld [vmem:[#allocation9 + $0xa4] ss:$8 sps:$4 sm:$0xff]   ;;  %v2801_v23 = vld [vmem:[#allocation9 + $0xa0] ss:$8 sps:$4 sm:$0xff]   ;;  %v2802_v24 = vld [vmem:[#allocation9 + $0xb4] ss:$8 sps:$4 sm:$0xff]  }
  0x91   : > { %v2804_v25 = vld [vmem:[#allocation9 + $0xb0] ss:$8 sps:$4 sm:$0xff]   ;;  %v2805_v26 = vld [vmem:[#allocation9 + $0xc4] ss:$8 sps:$4 sm:$0xff]   ;;  %v2807_v27 = vld [vmem:[#allocation9 + $0xc0] ss:$8 sps:$4 sm:$0xff]  }
  0x92   : > { %689 = vmatpush1.bf16.msra.mxu0 %v2777_v5  ;;  %2626 = vmatpush1.bf16.msra.mxu1 %v2777_v5  ;;  %v2808_v28 = vld [vmem:[#allocation9 + $0xd4] ss:$8 sps:$4 sm:$0xff]   ;;  %v2810_v29 = vld [vmem:[#allocation9 + $0xd0] ss:$8 sps:$4 sm:$0xff]   ;;  %v2811_v30 = vld [vmem:[#allocation9 + $0xe4] ss:$8 sps:$4 sm:$0xff]  }
  0x93   : > { %690 = vmatprep.subr.bf16.mxu0 %v2778_v6  ;;  %2611 = vmatprep.subr.bf16.mxu1 %v2778_v6  ;;  %v2813_v31 = vld [vmem:[#allocation9 + $0xe0] ss:$8 sps:$4 sm:$0xff]   ;;  %v2814_v32 = vld [vmem:[#allocation9 + $0xf4] ss:$8 sps:$4 sm:$0xff]   ;;  %v2816_v33 = vld [vmem:[#allocation9 + $0xf0] ss:$8 sps:$4 sm:$0xff]  }
  0x94   : > { %v2817_v34 = vld [vmem:[#allocation8] ss:$8 sps:$4 sm:$0xff]   ;;  %v2823_v36 = vld [vmem:[#allocation8 + $0x14] ss:$8 sps:$4 sm:$0xff]   ;;  %v2827_v38 = vld [vmem:[#allocation8 + $0x10] ss:$8 sps:$4 sm:$0xff]  }
  0x95   : > { %v2820_v35 = vld [vmem:[#allocation8 + $0x80] ss:$8 sps:$4 sm:$0xff]   ;;  %v2825_v37 = vld [vmem:[#allocation8 + $0x94] ss:$8 sps:$4 sm:$0xff]   ;;  %v2828_v39 = vld [vmem:[#allocation8 + $0x90] ss:$8 sps:$4 sm:$0xff]  }
  0x96   : > { %691 = vmatpush1.bf16.msra.mxu0 %v2780_v7  ;;  %2627 = vmatpush1.bf16.msra.mxu1 %v2780_v7  ;;  %v2829_v40 = vld [vmem:[#allocation8 + $0x24] ss:$8 sps:$4 sm:$0xff]   ;;  %v2833_v42 = vld [vmem:[#allocation8 + $0x20] ss:$8 sps:$4 sm:$0xff]   ;;  %v2835_v44 = vld [vmem:[#allocation8 + $0x34] ss:$8 sps:$4 sm:$0xff]  }
  0x97   : > { %692 = vmatprep.subr.bf16.mxu0 %v2781_v8  ;;  %2612 = vmatprep.subr.bf16.mxu1 %v2781_v8  ;;  %v2831_v41 = vld [vmem:[#allocation8 + $0xa4] ss:$8 sps:$4 sm:$0xff]   ;;  %v2834_v43 = vld [vmem:[#allocation8 + $0xa0] ss:$8 sps:$4 sm:$0xff]   ;;  %v2837_v45 = vld [vmem:[#allocation8 + $0xb4] ss:$8 sps:$4 sm:$0xff]  }
  0x98   : > { %v2839_v46 = vld [vmem:[#allocation8 + $0x30] ss:$8 sps:$4 sm:$0xff]   ;;  %v2841_v48 = vld [vmem:[#allocation8 + $0x44] ss:$8 sps:$4 sm:$0xff]   ;;  %v2845_v50 = vld [vmem:[#allocation8 + $0x40] ss:$8 sps:$4 sm:$0xff]  }
  0x99   : > { %v2840_v47 = vld [vmem:[#allocation8 + $0xb0] ss:$8 sps:$4 sm:$0xff]   ;;  %v2843_v49 = vld [vmem:[#allocation8 + $0xc4] ss:$8 sps:$4 sm:$0xff]   ;;  %v2846_v51 = vld [vmem:[#allocation8 + $0xc0] ss:$8 sps:$4 sm:$0xff]  }
  0x9a   : > { %693 = vmatpush1.bf16.msra.mxu0 %v2783_v9  ;;  %2628 = vmatpush1.bf16.msra.mxu1 %v2783_v9  ;;  %v2847_v52 = vld [vmem:[#allocation8 + $0x54] ss:$8 sps:$4 sm:$0xff]   ;;  %v2851_v54 = vld [vmem:[#allocation8 + $0x50] ss:$8 sps:$4 sm:$0xff]   ;;  %v2853_v56 = vld [vmem:[#allocation8 + $0x64] ss:$8 sps:$4 sm:$0xff]  }
  0x9b   : > { %694 = vmatprep.subr.bf16.mxu0 %v2784_v10  ;;  %2613 = vmatprep.subr.bf16.mxu1 %v2784_v10  ;;  %v2849_v53 = vld [vmem:[#allocation8 + $0xd4] ss:$8 sps:$4 sm:$0xff]   ;;  %v2852_v55 = vld [vmem:[#allocation8 + $0xd0] ss:$8 sps:$4 sm:$0xff]   ;;  %v2855_v57 = vld [vmem:[#allocation8 + $0xe4] ss:$8 sps:$4 sm:$0xff]  }
  0x9c   : > { %v2857_v58 = vld [vmem:[#allocation8 + $0x60] ss:$8 sps:$4 sm:$0xff]   ;;  %v2859_v60 = vld [vmem:[#allocation8 + $0x74] ss:$8 sps:$4 sm:$0xff]   ;;  %v2863_v62 = vld [vmem:[#allocation8 + $0x70] ss:$8 sps:$4 sm:$0xff]  }
  0x9d   : > { %v2858_v59 = vld [vmem:[#allocation8 + $0xe0] ss:$8 sps:$4 sm:$0xff]   ;;  %v2861_v61 = vld [vmem:[#allocation8 + $0xf4] ss:$8 sps:$4 sm:$0xff]   ;;  %v2864_v63 = vld [vmem:[#allocation8 + $0xf0] ss:$8 sps:$4 sm:$0xff]  }
  0x9e   : > { %695 = vmatpush1.bf16.msra.mxu0 %v2786_v11  ;;  %2629 = vmatpush1.bf16.msra.mxu1 %v2786_v11  ;;  %v877_v4 = vld [vmem:[#allocation6] sm:$0xff]  ;;  %v878_v11 = vld [vmem:[#allocation6 + $0x8] sm:$0xff] }
  0x9f   : > { %696 = vmatprep.subr.bf16.mxu0 %v2787_v12  ;;  %2614 = vmatprep.subr.bf16.mxu1 %v2787_v12  ;;  %v893_v9 = vld [vmem:[#allocation6 + $0x80] sm:$0xff]  ;;  %v894_v13 = vld [vmem:[#allocation6 + $0x88] sm:$0xff] }
  0xa2   : > { %697 = vmatpush1.bf16.msra.mxu0 %v2789_v14  ;;  %2630 = vmatpush1.bf16.msra.mxu1 %v2789_v14 }
  0xa3   : > { %698 = vmatprep.subr.bf16.mxu0 %v2790_v16  ;;  %2615 = vmatprep.subr.bf16.mxu1 %v2790_v16 }
  0xa6   : > { %699 = vmatpush1.bf16.msra.mxu0 %v2792_v17  ;;  %2631 = vmatpush1.bf16.msra.mxu1 %v2792_v17 }
  0xa7   : > { %700 = vmatprep.subr.bf16.mxu0 %v2793_v18  ;;  %2616 = vmatprep.subr.bf16.mxu1 %v2793_v18 }
  0xaa   : > { %701 = vmatpush1.bf16.msra.mxu0 %v2795_v19  ;;  %2632 = vmatpush1.bf16.msra.mxu1 %v2795_v19 }
  0xab   : > { %702 = vmatprep.subr.bf16.mxu0 %v2796_v20  ;;  %2617 = vmatprep.subr.bf16.mxu1 %v2796_v20 }
  0xae   : > { %703 = vmatpush1.bf16.msra.mxu0 %v2798_v21  ;;  %2633 = vmatpush1.bf16.msra.mxu1 %v2798_v21 }
  0xaf   : > { %704 = vmatprep.subr.bf16.mxu0 %v2799_v22  ;;  %2618 = vmatprep.subr.bf16.mxu1 %v2799_v22 }
  0xb2   : > { %705 = vmatpush1.bf16.msra.mxu0 %v2801_v23  ;;  %2634 = vmatpush1.bf16.msra.mxu1 %v2801_v23 }
  0xb3   : > { %706 = vmatprep.subr.bf16.mxu0 %v2802_v24  ;;  %2619 = vmatprep.subr.bf16.mxu1 %v2802_v24 }
  0xb6   : > { %707 = vmatpush1.bf16.msra.mxu0 %v2804_v25  ;;  %2635 = vmatpush1.bf16.msra.mxu1 %v2804_v25 }
  0xb7   : > { %708 = vmatprep.subr.bf16.mxu0 %v2805_v26  ;;  %2620 = vmatprep.subr.bf16.mxu1 %v2805_v26 }
  0xba   : > { %709 = vmatpush1.bf16.msra.mxu0 %v2807_v27  ;;  %2636 = vmatpush1.bf16.msra.mxu1 %v2807_v27 }
  0xbb   : > { %710 = vmatprep.subr.bf16.mxu0 %v2808_v28  ;;  %2621 = vmatprep.subr.bf16.mxu1 %v2808_v28  ;;  %v879_v28 = vld [vmem:[#allocation6 + $0x10] sm:$0xff] }
  0xbe   : > { %711 = vmatpush1.bf16.msra.mxu0 %v2810_v29  ;;  %2637 = vmatpush1.bf16.msra.mxu1 %v2810_v29 }
  0xbf   : > { %712 = vmatprep.subr.bf16.mxu0 %v2811_v30  ;;  %2622 = vmatprep.subr.bf16.mxu1 %v2811_v30 }
  0xc2   : > { %713 = vmatpush1.bf16.msra.mxu0 %v2813_v31  ;;  %2638 = vmatpush1.bf16.msra.mxu1 %v2813_v31 }
  0xc3   : > { %714 = vmatprep.subr.bf16.mxu0 %v2814_v32  ;;  %2623 = vmatprep.subr.bf16.mxu1 %v2814_v32 }
  0xc6   : > { %715 = vmatpush1.bf16.msra.mxu0 %v2816_v33  ;;  %2639 = vmatpush1.bf16.msra.mxu1 %v2816_v33  ;;  %v895_v33 = vld [vmem:[#allocation6 + $0x90] sm:$0xff] }
  0xc9   : > { %717 = vmatmul.mubr.bf16.vlgmr.msra.gmra.mrb[0].mxu0 %v2817_v34  ;;  %797 = vmatmul.mubr.bf16.vlgmr.msra.gmra.mrb[0].mxu1 %v2820_v35  ;;  %v880_v35 = vld [vmem:[#allocation6 + $0x18] sm:$0xff] }
  0xca   : > { %726 = vmatprep.mubr.bf16.mxu0 %v2823_v36  ;;  %806 = vmatprep.mubr.bf16.mxu1 %v2825_v37  ;;  %v896_v37 = vld [vmem:[#allocation6 + $0x98] sm:$0xff] }
  0xd1   : > { %727 = vmatmul.mubr.bf16.gmra.mrb[4].mxu0 %v2827_v38  ;;  %807 = vmatmul.mubr.bf16.gmra.mrb[4].mxu1 %v2828_v39 }
  0xd2   : > { %736 = vmatprep.mubr.bf16.mxu0 %v2829_v40  ;;  %816 = vmatprep.mubr.bf16.mxu1 %v2831_v41 }
  0xd9   : > { %737 = vmatmul.mubr.bf16.gmra.mrb[8].mxu0 %v2833_v42  ;;  %817 = vmatmul.mubr.bf16.gmra.mrb[8].mxu1 %v2834_v43 }
  0xda   : > { %746 = vmatprep.mubr.bf16.mxu0 %v2835_v44  ;;  %826 = vmatprep.mubr.bf16.mxu1 %v2837_v45 }
  0xe1   : > { %747 = vmatmul.mubr.bf16.gmra.mrb[12].mxu0 %v2839_v46  ;;  %827 = vmatmul.mubr.bf16.gmra.mrb[12].mxu1 %v2840_v47 }
  0xe2   : > { %756 = vmatprep.mubr.bf16.mxu0 %v2841_v48  ;;  %836 = vmatprep.mubr.bf16.mxu1 %v2843_v49 }
  0xe9   : > { %757 = vmatmul.mubr.bf16.gmra.mrb[16].mxu0 %v2845_v50  ;;  %837 = vmatmul.mubr.bf16.gmra.mrb[16].mxu1 %v2846_v51 }
  0xea   : > { %766 = vmatprep.mubr.bf16.mxu0 %v2847_v52  ;;  %846 = vmatprep.mubr.bf16.mxu1 %v2849_v53  ;;  %v881_v52 = vld [vmem:[#allocation6 + $0x20] sm:$0xff] }
  0xf1   : > { %767 = vmatmul.mubr.bf16.gmra.mrb[20].mxu0 %v2851_v54  ;;  %847 = vmatmul.mubr.bf16.gmra.mrb[20].mxu1 %v2852_v55 }
  0xf2   : > { %776 = vmatprep.mubr.bf16.mxu0 %v2853_v56  ;;  %856 = vmatprep.mubr.bf16.mxu1 %v2855_v57  ;;  %v897_v57 = vld [vmem:[#allocation6 + $0xa0] sm:$0xff] }
  0xf9   : > { %777 = vmatmul.mubr.bf16.gmra.mrb[24].mxu0 %v2857_v58  ;;  %857 = vmatmul.mubr.bf16.gmra.mrb[24].mxu1 %v2858_v59  ;;  %v882_v59 = vld [vmem:[#allocation6 + $0x28] sm:$0xff] }
  0xfa   : > { %786 = vmatprep.mubr.bf16.mxu0 %v2859_v60  ;;  %866 = vmatprep.mubr.bf16.mxu1 %v2861_v61  ;;  %v898_v61 = vld [vmem:[#allocation6 + $0xa8] sm:$0xff] }
 0x101   : > { %787 = vmatmul.mubr.bf16.gmra.mrb[28].mxu0 %v2863_v62  ;;  %867 = vmatmul.mubr.bf16.gmra.mrb[28].mxu1 %v2864_v63 }
 0x19c   : > { %v718_v0 = vpop.f32.mrb[0].mxu0  ;;  %v798_v1 = vpop.f32.mrb[0].mxu1 }
 0x19d   : > { %v720_v2 = vpop.f32.mrb[1].mxu0  ;;  %v800_v3 = vpop.f32.mrb[1].mxu1 }
 0x19e   : > { %v2574_v5 = vpack.c.bf16 %v720_v2, %v718_v0  ;;  %v2590_v6 = vpack.c.bf16 %v800_v3, %v798_v1  ;;  %v722_v7 = vpop.f32.mrb[2].mxu0  ;;  %v802_v8 = vpop.f32.mrb[2].mxu1 }
 0x19f   : > { %v724_v10 = vpop.f32.mrb[3].mxu0  ;;  %v804_v12 = vpop.f32.mrb[3].mxu1 }
 0x1a0   : > { %v2575_v14 = vpack.c.bf16 %v724_v10, %v722_v7  ;;  %v2591_v15 = vpack.c.bf16 %v804_v12, %v802_v8  ;;  %v1101_v16 = vadd.bf16 %v2574_v5, %v877_v4  ;;  %v1117_v17 = vadd.bf16 %v2590_v6, %v893_v9  ;;  %v883_v12 = vld [vmem:[#allocation6 + $0x30] sm:$0xff] }
 0x1a2   : > { %v1102_v18 = vadd.bf16 %v2575_v14, %v878_v11  ;;  %v1118_v19 = vadd.bf16 %v2591_v15, %v894_v13 }
 0x1a4   : > { %v2470_v20 = vcombine.low %v1101_v16, %v1102_v18  ;;  %v2471_v21 = vcombine.high %v1101_v16, %v1102_v18  ;;  %v2486_v22 = vcombine.low %v1117_v17, %v1118_v19  ;;  %v2487_v23 = vcombine.high %v1117_v17, %v1118_v19  ;;  %v728_v24 = vpop.f32.mrb[4].mxu0  ;;  %v808_v25 = vpop.f32.mrb[4].mxu1  ;;  %v899_v17 = vld [vmem:[#allocation6 + $0xb0] sm:$0xff]  ;;  %v884_v19 = vld [vmem:[#allocation6 + $0x38] sm:$0xff] }
 0x1a5   : > { %v730_v26 = vpop.f32.mrb[5].mxu0  ;;  %v810_v27 = vpop.f32.mrb[5].mxu1 }
 0x1a6   : > { %1293 = vst [vmem:[#allocation2] sm:$0xff] %v2470_v20  ;;  %1294 = vst [vmem:[#allocation2 + $0x8] sm:$0xff] %v2471_v21  ;;  %v2576_v29 = vpack.c.bf16 %v730_v26, %v728_v24  ;;  %v2592_v30 = vpack.c.bf16 %v810_v27, %v808_v25  ;;  %v732_v31 = vpop.f32.mrb[6].mxu0  ;;  %v812_v32 = vpop.f32.mrb[6].mxu1  ;;  %v900_v21 = vld [vmem:[#allocation6 + $0xb8] sm:$0xff] }
 0x1a7   : > { %1309 = vst [vmem:[#allocation2 + $0x80] sm:$0xff] %v2486_v22  ;;  %1310 = vst [vmem:[#allocation2 + $0x88] sm:$0xff] %v2487_v23  ;;  %v734_v34 = vpop.f32.mrb[7].mxu0  ;;  %v814_v36 = vpop.f32.mrb[7].mxu1 }
 0x1a8   : > { %v2577_v38 = vpack.c.bf16 %v734_v34, %v732_v31  ;;  %v2593_v39 = vpack.c.bf16 %v814_v36, %v812_v32  ;;  %v1103_v40 = vadd.bf16 %v2576_v29, %v879_v28  ;;  %v1119_v41 = vadd.bf16 %v2592_v30, %v895_v33  ;;  %v885_v36 = vld [vmem:[#allocation6 + $0x40] sm:$0xff] }
 0x1aa   : > { %v1104_v42 = vadd.bf16 %v2577_v38, %v880_v35  ;;  %v1120_v43 = vadd.bf16 %v2593_v39, %v896_v37 }
 0x1ac   : > { %v2472_v44 = vcombine.low %v1103_v40, %v1104_v42  ;;  %v2473_v45 = vcombine.high %v1103_v40, %v1104_v42  ;;  %v2488_v46 = vcombine.low %v1119_v41, %v1120_v43  ;;  %v2489_v47 = vcombine.high %v1119_v41, %v1120_v43  ;;  %v738_v48 = vpop.f32.mrb[8].mxu0  ;;  %v818_v49 = vpop.f32.mrb[8].mxu1  ;;  %v901_v41 = vld [vmem:[#allocation6 + $0xc0] sm:$0xff]  ;;  %v886_v43 = vld [vmem:[#allocation6 + $0x48] sm:$0xff] }
 0x1ad   : > { %v740_v50 = vpop.f32.mrb[9].mxu0  ;;  %v820_v51 = vpop.f32.mrb[9].mxu1 }
 0x1ae   : > { %1295 = vst [vmem:[#allocation2 + $0x10] sm:$0xff] %v2472_v44  ;;  %1296 = vst [vmem:[#allocation2 + $0x18] sm:$0xff] %v2473_v45  ;;  %v2578_v53 = vpack.c.bf16 %v740_v50, %v738_v48  ;;  %v2594_v54 = vpack.c.bf16 %v820_v51, %v818_v49  ;;  %v742_v55 = vpop.f32.mrb[10].mxu0  ;;  %v822_v56 = vpop.f32.mrb[10].mxu1  ;;  %v902_v45 = vld [vmem:[#allocation6 + $0xc8] sm:$0xff] }
 0x1af   : > { %1311 = vst [vmem:[#allocation2 + $0x90] sm:$0xff] %v2488_v46  ;;  %1312 = vst [vmem:[#allocation2 + $0x98] sm:$0xff] %v2489_v47  ;;  %v744_v58 = vpop.f32.mrb[11].mxu0  ;;  %v824_v60 = vpop.f32.mrb[11].mxu1 }
 0x1b0   : > { %v2579_v62 = vpack.c.bf16 %v744_v58, %v742_v55  ;;  %v2595_v63 = vpack.c.bf16 %v824_v60, %v822_v56  ;;  %v1105_v0 = vadd.bf16 %v2578_v53, %v881_v52  ;;  %v1121_v1 = vadd.bf16 %v2594_v54, %v897_v57  ;;  %v887_v60 = vld [vmem:[#allocation6 + $0x50] sm:$0xff] }
 0x1b2   : > { %v1106_v2 = vadd.bf16 %v2579_v62, %v882_v59  ;;  %v1122_v3 = vadd.bf16 %v2595_v63, %v898_v61 }
 0x1b4   : > { %v2474_v4 = vcombine.low %v1105_v0, %v1106_v2  ;;  %v2475_v5 = vcombine.high %v1105_v0, %v1106_v2  ;;  %v2490_v6 = vcombine.low %v1121_v1, %v1122_v3  ;;  %v2491_v7 = vcombine.high %v1121_v1, %v1122_v3  ;;  %v748_v8 = vpop.f32.mrb[12].mxu0  ;;  %v828_v9 = vpop.f32.mrb[12].mxu1  ;;  %v903_v1 = vld [vmem:[#allocation6 + $0xd0] sm:$0xff]  ;;  %v888_v3 = vld [vmem:[#allocation6 + $0x58] sm:$0xff] }
 0x1b5   : > { %v750_v10 = vpop.f32.mrb[13].mxu0  ;;  %v830_v11 = vpop.f32.mrb[13].mxu1 }
 0x1b6   : > { %1297 = vst [vmem:[#allocation2 + $0x20] sm:$0xff] %v2474_v4  ;;  %1298 = vst [vmem:[#allocation2 + $0x28] sm:$0xff] %v2475_v5  ;;  %v2580_v13 = vpack.c.bf16 %v750_v10, %v748_v8  ;;  %v2596_v14 = vpack.c.bf16 %v830_v11, %v828_v9  ;;  %v752_v15 = vpop.f32.mrb[14].mxu0  ;;  %v832_v16 = vpop.f32.mrb[14].mxu1  ;;  %v904_v5 = vld [vmem:[#allocation6 + $0xd8] sm:$0xff] }
 0x1b7   : > { %1313 = vst [vmem:[#allocation2 + $0xa0] sm:$0xff] %v2490_v6  ;;  %1314 = vst [vmem:[#allocation2 + $0xa8] sm:$0xff] %v2491_v7  ;;  %v754_v18 = vpop.f32.mrb[15].mxu0  ;;  %v834_v20 = vpop.f32.mrb[15].mxu1 }
 0x1b8   : > { %v2581_v22 = vpack.c.bf16 %v754_v18, %v752_v15  ;;  %v2597_v23 = vpack.c.bf16 %v834_v20, %v832_v16  ;;  %v1107_v24 = vadd.bf16 %v2580_v13, %v883_v12  ;;  %v1123_v25 = vadd.bf16 %v2596_v14, %v899_v17  ;;  %v889_v20 = vld [vmem:[#allocation6 + $0x60] sm:$0xff] }
 0x1ba   : > { %v1108_v26 = vadd.bf16 %v2581_v22, %v884_v19  ;;  %v1124_v27 = vadd.bf16 %v2597_v23, %v900_v21 }
 0x1bc   : > { %v2476_v28 = vcombine.low %v1107_v24, %v1108_v26  ;;  %v2477_v29 = vcombine.high %v1107_v24, %v1108_v26  ;;  %v2492_v30 = vcombine.low %v1123_v25, %v1124_v27  ;;  %v2493_v31 = vcombine.high %v1123_v25, %v1124_v27  ;;  %v758_v32 = vpop.f32.mrb[16].mxu0  ;;  %v838_v33 = vpop.f32.mrb[16].mxu1  ;;  %v905_v25 = vld [vmem:[#allocation6 + $0xe0] sm:$0xff]  ;;  %v890_v27 = vld [vmem:[#allocation6 + $0x68] sm:$0xff] }
 0x1bd   : > { %v760_v34 = vpop.f32.mrb[17].mxu0  ;;  %v840_v35 = vpop.f32.mrb[17].mxu1 }
 0x1be   : > { %1299 = vst [vmem:[#allocation2 + $0x30] sm:$0xff] %v2476_v28  ;;  %1300 = vst [vmem:[#allocation2 + $0x38] sm:$0xff] %v2477_v29  ;;  %v2582_v37 = vpack.c.bf16 %v760_v34, %v758_v32  ;;  %v2598_v38 = vpack.c.bf16 %v840_v35, %v838_v33  ;;  %v762_v39 = vpop.f32.mrb[18].mxu0  ;;  %v842_v40 = vpop.f32.mrb[18].mxu1  ;;  %v906_v29 = vld [vmem:[#allocation6 + $0xe8] sm:$0xff] }
 0x1bf   : > { %1315 = vst [vmem:[#allocation2 + $0xb0] sm:$0xff] %v2492_v30  ;;  %1316 = vst [vmem:[#allocation2 + $0xb8] sm:$0xff] %v2493_v31  ;;  %v764_v42 = vpop.f32.mrb[19].mxu0  ;;  %v844_v44 = vpop.f32.mrb[19].mxu1 }
 0x1c0   : > { %v2583_v46 = vpack.c.bf16 %v764_v42, %v762_v39  ;;  %v2599_v47 = vpack.c.bf16 %v844_v44, %v842_v40  ;;  %v1109_v48 = vadd.bf16 %v2582_v37, %v885_v36  ;;  %v1125_v49 = vadd.bf16 %v2598_v38, %v901_v41  ;;  %v891_v44 = vld [vmem:[#allocation6 + $0x70] sm:$0xff] }
 0x1c2   : > { %v1110_v50 = vadd.bf16 %v2583_v46, %v886_v43  ;;  %v1126_v51 = vadd.bf16 %v2599_v47, %v902_v45 }
 0x1c4   : > { %v2478_v52 = vcombine.low %v1109_v48, %v1110_v50  ;;  %v2479_v53 = vcombine.high %v1109_v48, %v1110_v50  ;;  %v2494_v54 = vcombine.low %v1125_v49, %v1126_v51  ;;  %v2495_v55 = vcombine.high %v1125_v49, %v1126_v51  ;;  %v768_v56 = vpop.f32.mrb[20].mxu0  ;;  %v848_v57 = vpop.f32.mrb[20].mxu1  ;;  %v907_v49 = vld [vmem:[#allocation6 + $0xf0] sm:$0xff]  ;;  %v892_v51 = vld [vmem:[#allocation6 + $0x78] sm:$0xff] }
 0x1c5   : > { %v770_v58 = vpop.f32.mrb[21].mxu0  ;;  %v850_v59 = vpop.f32.mrb[21].mxu1 }
 0x1c6   : > { %1301 = vst [vmem:[#allocation2 + $0x40] sm:$0xff] %v2478_v52  ;;  %1302 = vst [vmem:[#allocation2 + $0x48] sm:$0xff] %v2479_v53  ;;  %v2584_v61 = vpack.c.bf16 %v770_v58, %v768_v56  ;;  %v2600_v62 = vpack.c.bf16 %v850_v59, %v848_v57  ;;  %v772_v63 = vpop.f32.mrb[22].mxu0  ;;  %v852_v0 = vpop.f32.mrb[22].mxu1  ;;  %v908_v53 = vld [vmem:[#allocation6 + $0xf8] sm:$0xff] }
 0x1c7   : > { %1317 = vst [vmem:[#allocation2 + $0xc0] sm:$0xff] %v2494_v54  ;;  %1318 = vst [vmem:[#allocation2 + $0xc8] sm:$0xff] %v2495_v55  ;;  %v774_v2 = vpop.f32.mrb[23].mxu0  ;;  %v854_v4 = vpop.f32.mrb[23].mxu1 }
 0x1c8   : > { %v2585_v6 = vpack.c.bf16 %v774_v2, %v772_v63  ;;  %v2601_v7 = vpack.c.bf16 %v854_v4, %v852_v0  ;;  %v1111_v8 = vadd.bf16 %v2584_v61, %v887_v60  ;;  %v1127_v9 = vadd.bf16 %v2600_v62, %v903_v1 }
 0x1ca   : > { %v1112_v10 = vadd.bf16 %v2585_v6, %v888_v3  ;;  %v1128_v11 = vadd.bf16 %v2601_v7, %v904_v5 }
 0x1cc   : > { %v2480_v12 = vcombine.low %v1111_v8, %v1112_v10  ;;  %v2481_v13 = vcombine.high %v1111_v8, %v1112_v10  ;;  %v2496_v14 = vcombine.low %v1127_v9, %v1128_v11  ;;  %v2497_v15 = vcombine.high %v1127_v9, %v1128_v11  ;;  %v778_v16 = vpop.f32.mrb[24].mxu0  ;;  %v858_v17 = vpop.f32.mrb[24].mxu1 }
 0x1cd   : > { %v780_v18 = vpop.f32.mrb[25].mxu0  ;;  %v860_v19 = vpop.f32.mrb[25].mxu1 }
 0x1ce   : > { %1303 = vst [vmem:[#allocation2 + $0x50] sm:$0xff] %v2480_v12  ;;  %1304 = vst [vmem:[#allocation2 + $0x58] sm:$0xff] %v2481_v13  ;;  %v2586_v21 = vpack.c.bf16 %v780_v18, %v778_v16  ;;  %v2602_v22 = vpack.c.bf16 %v860_v19, %v858_v17  ;;  %v782_v23 = vpop.f32.mrb[26].mxu0  ;;  %v862_v24 = vpop.f32.mrb[26].mxu1 }
 0x1cf   : > { %1319 = vst [vmem:[#allocation2 + $0xd0] sm:$0xff] %v2496_v14  ;;  %1320 = vst [vmem:[#allocation2 + $0xd8] sm:$0xff] %v2497_v15  ;;  %v784_v26 = vpop.f32.mrb[27].mxu0  ;;  %v864_v28 = vpop.f32.mrb[27].mxu1 }
 0x1d0   : > { %v2587_v30 = vpack.c.bf16 %v784_v26, %v782_v23  ;;  %v2603_v31 = vpack.c.bf16 %v864_v28, %v862_v24  ;;  %v1113_v32 = vadd.bf16 %v2586_v21, %v889_v20  ;;  %v1129_v33 = vadd.bf16 %v2602_v22, %v905_v25 }
 0x1d2   : > { %v1114_v34 = vadd.bf16 %v2587_v30, %v890_v27  ;;  %v1130_v35 = vadd.bf16 %v2603_v31, %v906_v29 }
 0x1d4   : > { %v2482_v36 = vcombine.low %v1113_v32, %v1114_v34  ;;  %v2483_v37 = vcombine.high %v1113_v32, %v1114_v34  ;;  %v2498_v38 = vcombine.low %v1129_v33, %v1130_v35  ;;  %v2499_v39 = vcombine.high %v1129_v33, %v1130_v35  ;;  %v788_v40 = vpop.f32.mrb[28].mxu0  ;;  %v868_v41 = vpop.f32.mrb[28].mxu1 }
 0x1d5   : > { %v790_v42 = vpop.f32.mrb[29].mxu0  ;;  %v870_v43 = vpop.f32.mrb[29].mxu1 }
 0x1d6   : > { %1305 = vst [vmem:[#allocation2 + $0x60] sm:$0xff] %v2482_v36  ;;  %1306 = vst [vmem:[#allocation2 + $0x68] sm:$0xff] %v2483_v37  ;;  %v2588_v45 = vpack.c.bf16 %v790_v42, %v788_v40  ;;  %v2604_v46 = vpack.c.bf16 %v870_v43, %v868_v41  ;;  %v792_v47 = vpop.f32.mrb[30].mxu0  ;;  %v872_v48 = vpop.f32.mrb[30].mxu1 }
 0x1d7   : > { %1321 = vst [vmem:[#allocation2 + $0xe0] sm:$0xff] %v2498_v38  ;;  %1322 = vst [vmem:[#allocation2 + $0xe8] sm:$0xff] %v2499_v39  ;;  %v794_v50 = vpop.f32.mrb[31].mxu0  ;;  %v874_v52 = vpop.f32.mrb[31].mxu1 }
 0x1d8   : > { %v2589_v54 = vpack.c.bf16 %v794_v50, %v792_v47  ;;  %v2605_v55 = vpack.c.bf16 %v874_v52, %v872_v48  ;;  %v1115_v56 = vadd.bf16 %v2588_v45, %v891_v44  ;;  %v1131_v57 = vadd.bf16 %v2604_v46, %v907_v49 }
 0x1da   : > { %v1116_v58 = vadd.bf16 %v2589_v54, %v892_v51  ;;  %v1132_v59 = vadd.bf16 %v2605_v55, %v908_v53 }
 0x1dc   : > { %v2484_v60 = vcombine.low %v1115_v56, %v1116_v58  ;;  %v2485_v61 = vcombine.high %v1115_v56, %v1116_v58  ;;  %v2500_v62 = vcombine.low %v1131_v57, %v1132_v59  ;;  %v2501_v63 = vcombine.high %v1131_v57, %v1132_v59 }
 0x1de   : > { %1307 = vst [vmem:[#allocation2 + $0x70] sm:$0xff] %v2484_v60  ;;  %1308 = vst [vmem:[#allocation2 + $0x78] sm:$0xff] %v2485_v61 }
 0x1df   : > { %1323 = vst [vmem:[#allocation2 + $0xf0] sm:$0xff] %v2500_v62  ;;  %1324 = vst [vmem:[#allocation2 + $0xf8] sm:$0xff] %v2501_v63 }
 0x1e0 PF: > { %v1390_v0 = vld [vmem:[#allocation2 + $0x8] sm:$0xff]  ;;  %v1389_v1 = vld [vmem:[#allocation2] sm:$0xff]  ;;  %v1392_v2 = vld [vmem:[#allocation2 + $0x18] sm:$0xff]  ;;  %s2607_s23 = sshll.u32 %s3157_s18, 14  ;;  %s2239_s25 = sshll.u32 %s3441_s5, 4  ;;  %s3637_s25 = int_to_ptr.vmem [resolvable:$true] %s2239_s25 }
 0x1e1   : > { %1741 = vmatprep.subr.bf16.mxu0 %v1390_v0  ;;  %2640 = vmatprep.subr.bf16.mxu1 %v1390_v0  ;;  %v1391_v3 = vld [vmem:[#allocation2 + $0x10] sm:$0xff]  ;;  %v1394_v4 = vld [vmem:[#allocation2 + $0x28] sm:$0xff]  ;;  %v1393_v5 = vld [vmem:[#allocation2 + $0x20] sm:$0xff]  ;;  %s3635_s29 = scalar_lea.hbm %s3696_s4, %s2607_s23  ;;  %s2223_s18 = scalar_lea.sflag [#allocation5], %s3422_s14 }
 0x1e2   : > { %1742 = vmatpush1.bf16.msra.mxu0 %v1389_v1  ;;  %2656 = vmatpush1.bf16.msra.mxu1 %v1389_v1  ;;  %v1396_v6 = vld [vmem:[#allocation2 + $0x38] sm:$0xff]  ;;  %v1395_v7 = vld [vmem:[#allocation2 + $0x30] sm:$0xff]  ;;  %v2867_v8 = vld [vmem:[%s3426_s22 + $0x4] ss:$8 sps:$4 sm:$0xff]   ;;  %s3075_s6 = scalar_lea.vmem %s3637_s25, 16384  ;;  %s3173_s26 = smov [#allocation11]  }
 0x1e3   : > { %1743 = vmatprep.subr.bf16.mxu0 %v1392_v2  ;;  %2641 = vmatprep.subr.bf16.mxu1 %v1392_v2  ;;  %v1398_v9 = vld [vmem:[#allocation2 + $0x48] sm:$0xff]  ;;  %v1397_v11 = vld [vmem:[#allocation2 + $0x40] sm:$0xff]  ;;  %v1400_v12 = vld [vmem:[#allocation2 + $0x58] sm:$0xff]  ;;  %p3076_p6 = scmp.ne.s32.totalorder %s3637_s25, %s3075_s6  ;;  %s3079_s10 = sshll.u32 %s3173_s26, 4  ;;  %s3080_s10 = int_to_ptr.vmem [resolvable:$false] %s3079_s10 }
 0x1e4   : > { %1773 = vmatprep.mubr.bf16.mxu0 %v2867_v8  ;;  %v2870_v10 = vld [vmem:[%s3426_s22 + $0x104] ss:$8 sps:$4 sm:$0xff]   ;;  %v1399_v13 = vld [vmem:[#allocation2 + $0x50] sm:$0xff]  ;;  %v1408_v20 = vld [vmem:[#allocation2 + $0x98] sm:$0xff]  ;;  %s3081_s28 = scalar_lea.vmem %s3080_s10, 32768  ;;  %p3082_p7 = scmp.lt.s32.totalorder %s3637_s25, %s3080_s10 }
 0x1e5   : > { %1933 = vmatprep.mubr.bf16.mxu1 %v2870_v10  ;;  %v1402_v14 = vld [vmem:[#allocation2 + $0x68] sm:$0xff]  ;;  %v1401_v15 = vld [vmem:[#allocation2 + $0x60] sm:$0xff]  ;;  %v1404_v16 = vld [vmem:[#allocation2 + $0x78] sm:$0xff]  ;;  %p3077_p3 = pnand %p3076_p6, %p3361_p10  ;;  %p3083_p9 = scmp.lt.s32.totalorder %s3081_s28, %s3075_s6 }
 0x1e6   : > { %1744 = vmatpush1.bf16.msra.mxu0 %v1391_v3  ;;  %2657 = vmatpush1.bf16.msra.mxu1 %v1391_v3  ;;  %v1403_v17 = vld [vmem:[#allocation2 + $0x70] sm:$0xff]  ;;  %v1406_v18 = vld [vmem:[#allocation2 + $0x88] sm:$0xff]  ;;  %v1405_v19 = vld [vmem:[#allocation2 + $0x80] sm:$0xff] }
 0x1e7   : > { %1745 = vmatprep.subr.bf16.mxu0 %v1394_v4  ;;  %2642 = vmatprep.subr.bf16.mxu1 %v1394_v4  ;;  %v1407_v21 = vld [vmem:[#allocation2 + $0x90] sm:$0xff]  ;;  %v1410_v22 = vld [vmem:[#allocation2 + $0xa8] sm:$0xff]  ;;  %v1409_v23 = vld [vmem:[#allocation2 + $0xa0] sm:$0xff]  ;;  %p3078_p5 = pneg %p3077_p3  ;;  %p3084_p0 = por %p3083_p9, %p3082_p7 }
 0x1e8   : > { %v1412_v24 = vld [vmem:[#allocation2 + $0xb8] sm:$0xff]  ;;  %v1411_v25 = vld [vmem:[#allocation2 + $0xb0] sm:$0xff]  ;;  %v1414_v26 = vld [vmem:[#allocation2 + $0xc8] sm:$0xff] }
 0x1e9   : > { %v1413_v27 = vld [vmem:[#allocation2 + $0xc0] sm:$0xff]  ;;  %v1416_v28 = vld [vmem:[#allocation2 + $0xd8] sm:$0xff]  ;;  %v1415_v29 = vld [vmem:[#allocation2 + $0xd0] sm:$0xff]  ;;  %p3085_p4 = pnand %p3084_p0, %p3078_p5 }
 0x1ea   : > { %1746 = vmatpush1.bf16.msra.mxu0 %v1393_v5  ;;  %2658 = vmatpush1.bf16.msra.mxu1 %v1393_v5  ;;  %v1418_v30 = vld [vmem:[#allocation2 + $0xe8] sm:$0xff]  ;;  %v1417_v31 = vld [vmem:[#allocation2 + $0xe0] sm:$0xff]  ;;  %v1420_v32 = vld [vmem:[#allocation2 + $0xf8] sm:$0xff] }
 0x1eb   : > { %1747 = vmatprep.subr.bf16.mxu0 %v1396_v6  ;;  %2643 = vmatprep.subr.bf16.mxu1 %v1396_v6  ;;  %v1419_v33 = vld [vmem:[#allocation2 + $0xf0] sm:$0xff]  ;;  %v2865_v34 = vld [vmem:[%s3426_s22] ss:$8 sps:$4 sm:$0xff]   ;;  %v2877_v40 = vld [vmem:[%s3426_s22 + $0x24] ss:$8 sps:$4 sm:$0xff]  }
 0x1ec   : > { %v2868_v35 = vld [vmem:[%s3426_s22 + $0x100] ss:$8 sps:$4 sm:$0xff]   ;;  %v2871_v36 = vld [vmem:[%s3426_s22 + $0x14] ss:$8 sps:$4 sm:$0xff]   ;;  %v2875_v38 = vld [vmem:[%s3426_s22 + $0x10] ss:$8 sps:$4 sm:$0xff]  }
 0x1ed   : > { %v2873_v37 = vld [vmem:[%s3426_s22 + $0x114] ss:$8 sps:$4 sm:$0xff]   ;;  %v2876_v39 = vld [vmem:[%s3426_s22 + $0x110] ss:$8 sps:$4 sm:$0xff]   ;;  %v2879_v41 = vld [vmem:[%s3426_s22 + $0x124] ss:$8 sps:$4 sm:$0xff]  }
 0x1ee   : > { %1748 = vmatpush1.bf16.msra.mxu0 %v1395_v7  ;;  %2659 = vmatpush1.bf16.msra.mxu1 %v1395_v7  ;;  %v2881_v42 = vld [vmem:[%s3426_s22 + $0x20] ss:$8 sps:$4 sm:$0xff]   ;;  %v2883_v44 = vld [vmem:[%s3426_s22 + $0x34] ss:$8 sps:$4 sm:$0xff]   ;;  %v2887_v46 = vld [vmem:[%s3426_s22 + $0x30] ss:$8 sps:$4 sm:$0xff]  }
 0x1ef   : > { %1749 = vmatprep.subr.bf16.mxu0 %v1398_v9  ;;  %2644 = vmatprep.subr.bf16.mxu1 %v1398_v9  ;;  %v2882_v43 = vld [vmem:[%s3426_s22 + $0x120] ss:$8 sps:$4 sm:$0xff]   ;;  %v2885_v45 = vld [vmem:[%s3426_s22 + $0x134] ss:$8 sps:$4 sm:$0xff]   ;;  %v2888_v47 = vld [vmem:[%s3426_s22 + $0x130] ss:$8 sps:$4 sm:$0xff]  }
 0x1f0   : > { %v2889_v48 = vld [vmem:[%s3426_s22 + $0x44] ss:$8 sps:$4 sm:$0xff]   ;;  %v2893_v50 = vld [vmem:[%s3426_s22 + $0x40] ss:$8 sps:$4 sm:$0xff]   ;;  %v2895_v52 = vld [vmem:[%s3426_s22 + $0x54] ss:$8 sps:$4 sm:$0xff]  }
 0x1f1   : > { %v2891_v49 = vld [vmem:[%s3426_s22 + $0x144] ss:$8 sps:$4 sm:$0xff]   ;;  %v2894_v51 = vld [vmem:[%s3426_s22 + $0x140] ss:$8 sps:$4 sm:$0xff]   ;;  %v2897_v53 = vld [vmem:[%s3426_s22 + $0x154] ss:$8 sps:$4 sm:$0xff]  }
 0x1f2   : > { %1750 = vmatpush1.bf16.msra.mxu0 %v1397_v11  ;;  %2660 = vmatpush1.bf16.msra.mxu1 %v1397_v11  ;;  %v2899_v54 = vld [vmem:[%s3426_s22 + $0x50] ss:$8 sps:$4 sm:$0xff]   ;;  %v2901_v56 = vld [vmem:[%s3426_s22 + $0x64] ss:$8 sps:$4 sm:$0xff]   ;;  %v2905_v58 = vld [vmem:[%s3426_s22 + $0x60] ss:$8 sps:$4 sm:$0xff]  }
 0x1f3   : > { %1751 = vmatprep.subr.bf16.mxu0 %v1400_v12  ;;  %2645 = vmatprep.subr.bf16.mxu1 %v1400_v12  ;;  %v2900_v55 = vld [vmem:[%s3426_s22 + $0x150] ss:$8 sps:$4 sm:$0xff]   ;;  %v2903_v57 = vld [vmem:[%s3426_s22 + $0x164] ss:$8 sps:$4 sm:$0xff]   ;;  %v2906_v59 = vld [vmem:[%s3426_s22 + $0x160] ss:$8 sps:$4 sm:$0xff]  }
 0x1f4   : > { %v2907_v60 = vld [vmem:[%s3426_s22 + $0x74] ss:$8 sps:$4 sm:$0xff]   ;;  %v2911_v62 = vld [vmem:[%s3426_s22 + $0x70] ss:$8 sps:$4 sm:$0xff]   ;;  %v2913_v0 = vld [vmem:[%s3426_s22 + $0x84] ss:$8 sps:$4 sm:$0xff]  }
 0x1f5   : > { %v2909_v61 = vld [vmem:[%s3426_s22 + $0x174] ss:$8 sps:$4 sm:$0xff]   ;;  %v2912_v63 = vld [vmem:[%s3426_s22 + $0x170] ss:$8 sps:$4 sm:$0xff]   ;;  %v2915_v1 = vld [vmem:[%s3426_s22 + $0x184] ss:$8 sps:$4 sm:$0xff]  }
 0x1f6   : > { %1752 = vmatpush1.bf16.msra.mxu0 %v1399_v13  ;;  %2661 = vmatpush1.bf16.msra.mxu1 %v1399_v13  ;;  %v2917_v2 = vld [vmem:[%s3426_s22 + $0x80] ss:$8 sps:$4 sm:$0xff]   ;;  %v2919_v4 = vld [vmem:[%s3426_s22 + $0x94] ss:$8 sps:$4 sm:$0xff]   ;;  %v2923_v6 = vld [vmem:[%s3426_s22 + $0x90] ss:$8 sps:$4 sm:$0xff]  }
 0x1f7   : > { %1753 = vmatprep.subr.bf16.mxu0 %v1402_v14  ;;  %2646 = vmatprep.subr.bf16.mxu1 %v1402_v14  ;;  %v2918_v3 = vld [vmem:[%s3426_s22 + $0x180] ss:$8 sps:$4 sm:$0xff]   ;;  %v2921_v5 = vld [vmem:[%s3426_s22 + $0x194] ss:$8 sps:$4 sm:$0xff]   ;;  %v2924_v7 = vld [vmem:[%s3426_s22 + $0x190] ss:$8 sps:$4 sm:$0xff]  }
 0x1f8   : > { %v2925_v8 = vld [vmem:[%s3426_s22 + $0xa4] ss:$8 sps:$4 sm:$0xff]   ;;  %v2929_v10 = vld [vmem:[%s3426_s22 + $0xa0] ss:$8 sps:$4 sm:$0xff]   ;;  %v2931_v12 = vld [vmem:[%s3426_s22 + $0xb4] ss:$8 sps:$4 sm:$0xff]  }
 0x1f9   : > { %v2927_v9 = vld [vmem:[%s3426_s22 + $0x1a4] ss:$8 sps:$4 sm:$0xff]   ;;  %v2930_v11 = vld [vmem:[%s3426_s22 + $0x1a0] ss:$8 sps:$4 sm:$0xff]   ;;  %v2933_v13 = vld [vmem:[%s3426_s22 + $0x1b4] ss:$8 sps:$4 sm:$0xff]  }
 0x1fa   : > { %1754 = vmatpush1.bf16.msra.mxu0 %v1401_v15  ;;  %2662 = vmatpush1.bf16.msra.mxu1 %v1401_v15  ;;  %v2935_v14 = vld [vmem:[%s3426_s22 + $0xb0] ss:$8 sps:$4 sm:$0xff]  }
 0x1fb   : > { %1755 = vmatprep.subr.bf16.mxu0 %v1404_v16  ;;  %2647 = vmatprep.subr.bf16.mxu1 %v1404_v16  ;;  %v2936_v15 = vld [vmem:[%s3426_s22 + $0x1b0] ss:$8 sps:$4 sm:$0xff]   ;;  %v2937_v16 = vld [vmem:[%s3426_s22 + $0xc4] ss:$8 sps:$4 sm:$0xff]  }
 0x1fe   : > { %1756 = vmatpush1.bf16.msra.mxu0 %v1403_v17  ;;  %2663 = vmatpush1.bf16.msra.mxu1 %v1403_v17  ;;  %v2939_v17 = vld [vmem:[%s3426_s22 + $0x1c4] ss:$8 sps:$4 sm:$0xff]  }
 0x1ff   : > { %1757 = vmatprep.subr.bf16.mxu0 %v1406_v18  ;;  %2648 = vmatprep.subr.bf16.mxu1 %v1406_v18  ;;  %v2941_v18 = vld [vmem:[%s3426_s22 + $0xc0] ss:$8 sps:$4 sm:$0xff]  }
 0x202   : > { %1758 = vmatpush1.bf16.msra.mxu0 %v1405_v19  ;;  %2664 = vmatpush1.bf16.msra.mxu1 %v1405_v19  ;;  %v2942_v19 = vld [vmem:[%s3426_s22 + $0x1c0] ss:$8 sps:$4 sm:$0xff]  }
 0x203   : > { %1759 = vmatprep.subr.bf16.mxu0 %v1408_v20  ;;  %2649 = vmatprep.subr.bf16.mxu1 %v1408_v20  ;;  %v2943_v20 = vld [vmem:[%s3426_s22 + $0xd4] ss:$8 sps:$4 sm:$0xff]  }
 0x206   : > { %1760 = vmatpush1.bf16.msra.mxu0 %v1407_v21  ;;  %2665 = vmatpush1.bf16.msra.mxu1 %v1407_v21  ;;  %v2945_v21 = vld [vmem:[%s3426_s22 + $0x1d4] ss:$8 sps:$4 sm:$0xff]  }
 0x207   : > { %1761 = vmatprep.subr.bf16.mxu0 %v1410_v22  ;;  %2650 = vmatprep.subr.bf16.mxu1 %v1410_v22  ;;  %v2947_v22 = vld [vmem:[%s3426_s22 + $0xd0] ss:$8 sps:$4 sm:$0xff]  }
 0x20a   : > { %1762 = vmatpush1.bf16.msra.mxu0 %v1409_v23  ;;  %2666 = vmatpush1.bf16.msra.mxu1 %v1409_v23  ;;  %v2948_v23 = vld [vmem:[%s3426_s22 + $0x1d0] ss:$8 sps:$4 sm:$0xff]  }
 0x20b   : > { %1763 = vmatprep.subr.bf16.mxu0 %v1412_v24  ;;  %2651 = vmatprep.subr.bf16.mxu1 %v1412_v24  ;;  %v2949_v24 = vld [vmem:[%s3426_s22 + $0xe4] ss:$8 sps:$4 sm:$0xff]  }
 0x20e   : > { %1764 = vmatpush1.bf16.msra.mxu0 %v1411_v25  ;;  %2667 = vmatpush1.bf16.msra.mxu1 %v1411_v25  ;;  %v2951_v25 = vld [vmem:[%s3426_s22 + $0x1e4] ss:$8 sps:$4 sm:$0xff]  }
 0x20f   : > { %1765 = vmatprep.subr.bf16.mxu0 %v1414_v26  ;;  %2652 = vmatprep.subr.bf16.mxu1 %v1414_v26  ;;  %v2953_v26 = vld [vmem:[%s3426_s22 + $0xe0] ss:$8 sps:$4 sm:$0xff]  }
 0x212   : > { %1766 = vmatpush1.bf16.msra.mxu0 %v1413_v27  ;;  %2668 = vmatpush1.bf16.msra.mxu1 %v1413_v27  ;;  %v2954_v27 = vld [vmem:[%s3426_s22 + $0x1e0] ss:$8 sps:$4 sm:$0xff]  }
 0x213   : > { %1767 = vmatprep.subr.bf16.mxu0 %v1416_v28  ;;  %2653 = vmatprep.subr.bf16.mxu1 %v1416_v28  ;;  %v2955_v28 = vld [vmem:[%s3426_s22 + $0xf4] ss:$8 sps:$4 sm:$0xff]  }
 0x216   : > { %1768 = vmatpush1.bf16.msra.mxu0 %v1415_v29  ;;  %2669 = vmatpush1.bf16.msra.mxu1 %v1415_v29  ;;  %v2957_v29 = vld [vmem:[%s3426_s22 + $0x1f4] ss:$8 sps:$4 sm:$0xff]  }
 0x217   : > { %1769 = vmatprep.subr.bf16.mxu0 %v1418_v30  ;;  %2654 = vmatprep.subr.bf16.mxu1 %v1418_v30  ;;  %v2959_v30 = vld [vmem:[%s3426_s22 + $0xf0] ss:$8 sps:$4 sm:$0xff]  }
 0x21a   : > { %1770 = vmatpush1.bf16.msra.mxu0 %v1417_v31  ;;  %2670 = vmatpush1.bf16.msra.mxu1 %v1417_v31  ;;  %v2960_v31 = vld [vmem:[%s3426_s22 + $0x1f0] ss:$8 sps:$4 sm:$0xff]  }
 0x21b   : > { %1771 = vmatprep.subr.bf16.mxu0 %v1420_v32  ;;  %2655 = vmatprep.subr.bf16.mxu1 %v1420_v32 }
 0x21e   : > { %1772 = vmatpush1.bf16.msra.mxu0 %v1419_v33  ;;  %2671 = vmatpush1.bf16.msra.mxu1 %v1419_v33 }
 0x221   : > { %1774 = vmatmul.mubr.bf16.vlgmr.msra.gmra.mrb[0].mxu0 %v2865_v34  ;;  %1934 = vmatmul.mubr.bf16.vlgmr.msra.gmra.mrb[0].mxu1 %v2868_v35 }
 0x222   : > { %1783 = vmatprep.mubr.bf16.mxu0 %v2871_v36  ;;  %1943 = vmatprep.mubr.bf16.mxu1 %v2873_v37 }
 0x229   : > { %1784 = vmatmul.mubr.bf16.gmra.mrb[4].mxu0 %v2875_v38  ;;  %1944 = vmatmul.mubr.bf16.gmra.mrb[4].mxu1 %v2876_v39 }
 0x22a   : > { %1793 = vmatprep.mubr.bf16.mxu0 %v2877_v40  ;;  %1953 = vmatprep.mubr.bf16.mxu1 %v2879_v41 }
 0x231   : > { %1794 = vmatmul.mubr.bf16.gmra.mrb[8].mxu0 %v2881_v42  ;;  %1954 = vmatmul.mubr.bf16.gmra.mrb[8].mxu1 %v2882_v43 }
 0x232   : > { %1803 = vmatprep.mubr.bf16.mxu0 %v2883_v44  ;;  %1963 = vmatprep.mubr.bf16.mxu1 %v2885_v45 }
 0x239   : > { %1804 = vmatmul.mubr.bf16.gmra.mrb[12].mxu0 %v2887_v46  ;;  %1964 = vmatmul.mubr.bf16.gmra.mrb[12].mxu1 %v2888_v47 }
 0x23a   : > { %1813 = vmatprep.mubr.bf16.mxu0 %v2889_v48  ;;  %1973 = vmatprep.mubr.bf16.mxu1 %v2891_v49 }
 0x241   : > { %1814 = vmatmul.mubr.bf16.gmra.mrb[16].mxu0 %v2893_v50  ;;  %1974 = vmatmul.mubr.bf16.gmra.mrb[16].mxu1 %v2894_v51 }
 0x242   : > { %1823 = vmatprep.mubr.bf16.mxu0 %v2895_v52  ;;  %1983 = vmatprep.mubr.bf16.mxu1 %v2897_v53 }
 0x249   : > { %1824 = vmatmul.mubr.bf16.gmra.mrb[20].mxu0 %v2899_v54  ;;  %1984 = vmatmul.mubr.bf16.gmra.mrb[20].mxu1 %v2900_v55 }
 0x24a   : > { %1833 = vmatprep.mubr.bf16.mxu0 %v2901_v56  ;;  %1993 = vmatprep.mubr.bf16.mxu1 %v2903_v57 }
 0x251   : > { %1834 = vmatmul.mubr.bf16.gmra.mrb[24].mxu0 %v2905_v58  ;;  %1994 = vmatmul.mubr.bf16.gmra.mrb[24].mxu1 %v2906_v59 }
 0x252   : > { %1843 = vmatprep.mubr.bf16.mxu0 %v2907_v60  ;;  %2003 = vmatprep.mubr.bf16.mxu1 %v2909_v61 }
 0x259   : > { %1844 = vmatmul.mubr.bf16.gmra.mrb[28].mxu0 %v2911_v62  ;;  %2004 = vmatmul.mubr.bf16.gmra.mrb[28].mxu1 %v2912_v63 }
 0x25a   : > { %1853 = vmatprep.mubr.bf16.mxu0 %v2913_v0  ;;  %2013 = vmatprep.mubr.bf16.mxu1 %v2915_v1 }
 0x261   : > { %1854 = vmatmul.mubr.bf16.gmra.mrb[32].mxu0 %v2917_v2  ;;  %2014 = vmatmul.mubr.bf16.gmra.mrb[32].mxu1 %v2918_v3 }
 0x262   : > { %1863 = vmatprep.mubr.bf16.mxu0 %v2919_v4  ;;  %2023 = vmatprep.mubr.bf16.mxu1 %v2921_v5 }
 0x269   : > { %1864 = vmatmul.mubr.bf16.gmra.mrb[36].mxu0 %v2923_v6  ;;  %2024 = vmatmul.mubr.bf16.gmra.mrb[36].mxu1 %v2924_v7 }
 0x26a   : > { %1873 = vmatprep.mubr.bf16.mxu0 %v2925_v8  ;;  %2033 = vmatprep.mubr.bf16.mxu1 %v2927_v9 }
 0x271   : > { %1874 = vmatmul.mubr.bf16.gmra.mrb[40].mxu0 %v2929_v10  ;;  %2034 = vmatmul.mubr.bf16.gmra.mrb[40].mxu1 %v2930_v11 }
 0x272   : > { %1883 = vmatprep.mubr.bf16.mxu0 %v2931_v12  ;;  %2043 = vmatprep.mubr.bf16.mxu1 %v2933_v13 }
 0x279   : > { %1884 = vmatmul.mubr.bf16.gmra.mrb[44].mxu0 %v2935_v14  ;;  %2044 = vmatmul.mubr.bf16.gmra.mrb[44].mxu1 %v2936_v15 }
 0x27a   : > { %1893 = vmatprep.mubr.bf16.mxu0 %v2937_v16  ;;  %2053 = vmatprep.mubr.bf16.mxu1 %v2939_v17 }
 0x281   : > { %1894 = vmatmul.mubr.bf16.gmra.mrb[48].mxu0 %v2941_v18  ;;  %2054 = vmatmul.mubr.bf16.gmra.mrb[48].mxu1 %v2942_v19 }
 0x282   : > { %1903 = vmatprep.mubr.bf16.mxu0 %v2943_v20  ;;  %2063 = vmatprep.mubr.bf16.mxu1 %v2945_v21 }
 0x289   : > { %1904 = vmatmul.mubr.bf16.gmra.mrb[52].mxu0 %v2947_v22  ;;  %2064 = vmatmul.mubr.bf16.gmra.mrb[52].mxu1 %v2948_v23 }
 0x28a   : > { %1913 = vmatprep.mubr.bf16.mxu0 %v2949_v24  ;;  %2073 = vmatprep.mubr.bf16.mxu1 %v2951_v25 }
 0x291   : > { %1914 = vmatmul.mubr.bf16.gmra.mrb[56].mxu0 %v2953_v26  ;;  %2074 = vmatmul.mubr.bf16.gmra.mrb[56].mxu1 %v2954_v27 }
 0x292   : > { %1923 = vmatprep.mubr.bf16.mxu0 %v2955_v28  ;;  %2083 = vmatprep.mubr.bf16.mxu1 %v2957_v29 }
 0x299   : > { %1924 = vmatmul.mubr.bf16.gmra.mrb[60].mxu0 %v2959_v30  ;;  %2084 = vmatmul.mubr.bf16.gmra.mrb[60].mxu1 %v2960_v31 }
 0x2f4   : > { %v1775_v32 = vpop.f32.mrb[0].mxu0  ;;  %v1935_v33 = vpop.f32.mrb[0].mxu1 }
 0x2f5   : > { %2094 = vst [vmem:[%s3441_s5] sm:$0xff] %v1775_v32  ;;  %2158 = vst [vmem:[%s3441_s5 + $0x200] sm:$0xff] %v1935_v33  ;;  %v1777_v34 = vpop.f32.mrb[1].mxu0  ;;  %v1937_v35 = vpop.f32.mrb[1].mxu1 }
 0x2f6   : > { %2095 = vst [vmem:[%s3441_s5 + $0x8] sm:$0xff] %v1777_v34  ;;  %2159 = vst [vmem:[%s3441_s5 + $0x208] sm:$0xff] %v1937_v35  ;;  %v1779_v36 = vpop.f32.mrb[2].mxu0  ;;  %v1939_v37 = vpop.f32.mrb[2].mxu1 }
 0x2f7   : > { %2096 = vst [vmem:[%s3441_s5 + $0x10] sm:$0xff] %v1779_v36  ;;  %2160 = vst [vmem:[%s3441_s5 + $0x210] sm:$0xff] %v1939_v37  ;;  %v1781_v38 = vpop.f32.mrb[3].mxu0  ;;  %v1941_v39 = vpop.f32.mrb[3].mxu1 }
 0x2f8   : > { %2097 = vst [vmem:[%s3441_s5 + $0x18] sm:$0xff] %v1781_v38  ;;  %2161 = vst [vmem:[%s3441_s5 + $0x218] sm:$0xff] %v1941_v39 }
 0x2fc   : > { %v1785_v40 = vpop.f32.mrb[4].mxu0  ;;  %v1945_v41 = vpop.f32.mrb[4].mxu1 }
 0x2fd   : > { %2098 = vst [vmem:[%s3441_s5 + $0x20] sm:$0xff] %v1785_v40  ;;  %2162 = vst [vmem:[%s3441_s5 + $0x220] sm:$0xff] %v1945_v41  ;;  %v1787_v42 = vpop.f32.mrb[5].mxu0  ;;  %v1947_v43 = vpop.f32.mrb[5].mxu1 }
 0x2fe   : > { %2099 = vst [vmem:[%s3441_s5 + $0x28] sm:$0xff] %v1787_v42  ;;  %2163 = vst [vmem:[%s3441_s5 + $0x228] sm:$0xff] %v1947_v43  ;;  %v1789_v44 = vpop.f32.mrb[6].mxu0  ;;  %v1949_v45 = vpop.f32.mrb[6].mxu1 }
 0x2ff   : > { %2100 = vst [vmem:[%s3441_s5 + $0x30] sm:$0xff] %v1789_v44  ;;  %2164 = vst [vmem:[%s3441_s5 + $0x230] sm:$0xff] %v1949_v45  ;;  %v1791_v46 = vpop.f32.mrb[7].mxu0  ;;  %v1951_v47 = vpop.f32.mrb[7].mxu1 }
 0x300   : > { %2101 = vst [vmem:[%s3441_s5 + $0x38] sm:$0xff] %v1791_v46  ;;  %2165 = vst [vmem:[%s3441_s5 + $0x238] sm:$0xff] %v1951_v47 }
 0x304   : > { %v1795_v48 = vpop.f32.mrb[8].mxu0  ;;  %v1955_v49 = vpop.f32.mrb[8].mxu1 }
 0x305   : > { %2102 = vst [vmem:[%s3441_s5 + $0x40] sm:$0xff] %v1795_v48  ;;  %2166 = vst [vmem:[%s3441_s5 + $0x240] sm:$0xff] %v1955_v49  ;;  %v1797_v50 = vpop.f32.mrb[9].mxu0  ;;  %v1957_v51 = vpop.f32.mrb[9].mxu1 }
 0x306   : > { %2103 = vst [vmem:[%s3441_s5 + $0x48] sm:$0xff] %v1797_v50  ;;  %2167 = vst [vmem:[%s3441_s5 + $0x248] sm:$0xff] %v1957_v51  ;;  %v1799_v52 = vpop.f32.mrb[10].mxu0  ;;  %v1959_v53 = vpop.f32.mrb[10].mxu1 }
 0x307   : > { %2104 = vst [vmem:[%s3441_s5 + $0x50] sm:$0xff] %v1799_v52  ;;  %2168 = vst [vmem:[%s3441_s5 + $0x250] sm:$0xff] %v1959_v53  ;;  %v1801_v54 = vpop.f32.mrb[11].mxu0  ;;  %v1961_v55 = vpop.f32.mrb[11].mxu1 }
 0x308   : > { %2105 = vst [vmem:[%s3441_s5 + $0x58] sm:$0xff] %v1801_v54  ;;  %2169 = vst [vmem:[%s3441_s5 + $0x258] sm:$0xff] %v1961_v55 }
 0x30c   : > { %v1805_v56 = vpop.f32.mrb[12].mxu0  ;;  %v1965_v57 = vpop.f32.mrb[12].mxu1 }
 0x30d   : > { %2106 = vst [vmem:[%s3441_s5 + $0x60] sm:$0xff] %v1805_v56  ;;  %2170 = vst [vmem:[%s3441_s5 + $0x260] sm:$0xff] %v1965_v57  ;;  %v1807_v58 = vpop.f32.mrb[13].mxu0  ;;  %v1967_v59 = vpop.f32.mrb[13].mxu1 }
 0x30e   : > { %2107 = vst [vmem:[%s3441_s5 + $0x68] sm:$0xff] %v1807_v58  ;;  %2171 = vst [vmem:[%s3441_s5 + $0x268] sm:$0xff] %v1967_v59  ;;  %v1809_v60 = vpop.f32.mrb[14].mxu0  ;;  %v1969_v61 = vpop.f32.mrb[14].mxu1 }
 0x30f   : > { %2108 = vst [vmem:[%s3441_s5 + $0x70] sm:$0xff] %v1809_v60  ;;  %2172 = vst [vmem:[%s3441_s5 + $0x270] sm:$0xff] %v1969_v61  ;;  %v1811_v62 = vpop.f32.mrb[15].mxu0  ;;  %v1971_v63 = vpop.f32.mrb[15].mxu1 }
 0x310   : > { %2109 = vst [vmem:[%s3441_s5 + $0x78] sm:$0xff] %v1811_v62  ;;  %2173 = vst [vmem:[%s3441_s5 + $0x278] sm:$0xff] %v1971_v63 }
 0x314   : > { %v1815_v0 = vpop.f32.mrb[16].mxu0  ;;  %v1975_v1 = vpop.f32.mrb[16].mxu1 }
 0x315   : > { %2110 = vst [vmem:[%s3441_s5 + $0x80] sm:$0xff] %v1815_v0  ;;  %2174 = vst [vmem:[%s3441_s5 + $0x280] sm:$0xff] %v1975_v1  ;;  %v1817_v2 = vpop.f32.mrb[17].mxu0  ;;  %v1977_v3 = vpop.f32.mrb[17].mxu1 }
 0x316   : > { %2111 = vst [vmem:[%s3441_s5 + $0x88] sm:$0xff] %v1817_v2  ;;  %2175 = vst [vmem:[%s3441_s5 + $0x288] sm:$0xff] %v1977_v3  ;;  %v1819_v4 = vpop.f32.mrb[18].mxu0  ;;  %v1979_v5 = vpop.f32.mrb[18].mxu1 }
 0x317   : > { %2112 = vst [vmem:[%s3441_s5 + $0x90] sm:$0xff] %v1819_v4  ;;  %2176 = vst [vmem:[%s3441_s5 + $0x290] sm:$0xff] %v1979_v5  ;;  %v1821_v6 = vpop.f32.mrb[19].mxu0  ;;  %v1981_v7 = vpop.f32.mrb[19].mxu1 }
 0x318   : > { %2113 = vst [vmem:[%s3441_s5 + $0x98] sm:$0xff] %v1821_v6  ;;  %2177 = vst [vmem:[%s3441_s5 + $0x298] sm:$0xff] %v1981_v7 }
 0x31c   : > { %v1825_v8 = vpop.f32.mrb[20].mxu0  ;;  %v1985_v9 = vpop.f32.mrb[20].mxu1 }
 0x31d   : > { %2114 = vst [vmem:[%s3441_s5 + $0xa0] sm:$0xff] %v1825_v8  ;;  %2178 = vst [vmem:[%s3441_s5 + $0x2a0] sm:$0xff] %v1985_v9  ;;  %v1827_v10 = vpop.f32.mrb[21].mxu0  ;;  %v1987_v11 = vpop.f32.mrb[21].mxu1 }
 0x31e   : > { %2115 = vst [vmem:[%s3441_s5 + $0xa8] sm:$0xff] %v1827_v10  ;;  %2179 = vst [vmem:[%s3441_s5 + $0x2a8] sm:$0xff] %v1987_v11  ;;  %v1829_v12 = vpop.f32.mrb[22].mxu0  ;;  %v1989_v13 = vpop.f32.mrb[22].mxu1 }
 0x31f   : > { %2116 = vst [vmem:[%s3441_s5 + $0xb0] sm:$0xff] %v1829_v12  ;;  %2180 = vst [vmem:[%s3441_s5 + $0x2b0] sm:$0xff] %v1989_v13  ;;  %v1831_v14 = vpop.f32.mrb[23].mxu0  ;;  %v1991_v15 = vpop.f32.mrb[23].mxu1 }
 0x320   : > { %2117 = vst [vmem:[%s3441_s5 + $0xb8] sm:$0xff] %v1831_v14  ;;  %2181 = vst [vmem:[%s3441_s5 + $0x2b8] sm:$0xff] %v1991_v15 }
 0x324   : > { %v1835_v16 = vpop.f32.mrb[24].mxu0  ;;  %v1995_v17 = vpop.f32.mrb[24].mxu1 }
 0x325   : > { %2118 = vst [vmem:[%s3441_s5 + $0xc0] sm:$0xff] %v1835_v16  ;;  %2182 = vst [vmem:[%s3441_s5 + $0x2c0] sm:$0xff] %v1995_v17  ;;  %v1837_v18 = vpop.f32.mrb[25].mxu0  ;;  %v1997_v19 = vpop.f32.mrb[25].mxu1 }
 0x326   : > { %2119 = vst [vmem:[%s3441_s5 + $0xc8] sm:$0xff] %v1837_v18  ;;  %2183 = vst [vmem:[%s3441_s5 + $0x2c8] sm:$0xff] %v1997_v19  ;;  %v1839_v20 = vpop.f32.mrb[26].mxu0  ;;  %v1999_v21 = vpop.f32.mrb[26].mxu1 }
 0x327   : > { %2120 = vst [vmem:[%s3441_s5 + $0xd0] sm:$0xff] %v1839_v20  ;;  %2184 = vst [vmem:[%s3441_s5 + $0x2d0] sm:$0xff] %v1999_v21  ;;  %v1841_v22 = vpop.f32.mrb[27].mxu0  ;;  %v2001_v23 = vpop.f32.mrb[27].mxu1 }
 0x328   : > { %2121 = vst [vmem:[%s3441_s5 + $0xd8] sm:$0xff] %v1841_v22  ;;  %2185 = vst [vmem:[%s3441_s5 + $0x2d8] sm:$0xff] %v2001_v23 }
 0x32c   : > { %v1845_v24 = vpop.f32.mrb[28].mxu0  ;;  %v2005_v25 = vpop.f32.mrb[28].mxu1 }
 0x32d   : > { %2122 = vst [vmem:[%s3441_s5 + $0xe0] sm:$0xff] %v1845_v24  ;;  %2186 = vst [vmem:[%s3441_s5 + $0x2e0] sm:$0xff] %v2005_v25  ;;  %v1847_v26 = vpop.f32.mrb[29].mxu0  ;;  %v2007_v27 = vpop.f32.mrb[29].mxu1 }
 0x32e   : > { %2123 = vst [vmem:[%s3441_s5 + $0xe8] sm:$0xff] %v1847_v26  ;;  %2187 = vst [vmem:[%s3441_s5 + $0x2e8] sm:$0xff] %v2007_v27  ;;  %v1849_v28 = vpop.f32.mrb[30].mxu0  ;;  %v2009_v29 = vpop.f32.mrb[30].mxu1 }
 0x32f   : > { %2124 = vst [vmem:[%s3441_s5 + $0xf0] sm:$0xff] %v1849_v28  ;;  %2188 = vst [vmem:[%s3441_s5 + $0x2f0] sm:$0xff] %v2009_v29  ;;  %v1851_v30 = vpop.f32.mrb[31].mxu0  ;;  %v2011_v31 = vpop.f32.mrb[31].mxu1 }
 0x330   : > { %2125 = vst [vmem:[%s3441_s5 + $0xf8] sm:$0xff] %v1851_v30  ;;  %2189 = vst [vmem:[%s3441_s5 + $0x2f8] sm:$0xff] %v2011_v31 }
 0x334   : > { %v1855_v32 = vpop.f32.mrb[32].mxu0  ;;  %v2015_v33 = vpop.f32.mrb[32].mxu1 }
 0x335   : > { %2126 = vst [vmem:[%s3441_s5 + $0x100] sm:$0xff] %v1855_v32  ;;  %2190 = vst [vmem:[%s3441_s5 + $0x300] sm:$0xff] %v2015_v33  ;;  %v1857_v34 = vpop.f32.mrb[33].mxu0  ;;  %v2017_v35 = vpop.f32.mrb[33].mxu1 }
 0x336   : > { %2127 = vst [vmem:[%s3441_s5 + $0x108] sm:$0xff] %v1857_v34  ;;  %2191 = vst [vmem:[%s3441_s5 + $0x308] sm:$0xff] %v2017_v35  ;;  %v1859_v36 = vpop.f32.mrb[34].mxu0  ;;  %v2019_v37 = vpop.f32.mrb[34].mxu1 }
 0x337   : > { %2128 = vst [vmem:[%s3441_s5 + $0x110] sm:$0xff] %v1859_v36  ;;  %2192 = vst [vmem:[%s3441_s5 + $0x310] sm:$0xff] %v2019_v37  ;;  %v1861_v38 = vpop.f32.mrb[35].mxu0  ;;  %v2021_v39 = vpop.f32.mrb[35].mxu1 }
 0x338   : > { %2129 = vst [vmem:[%s3441_s5 + $0x118] sm:$0xff] %v1861_v38  ;;  %2193 = vst [vmem:[%s3441_s5 + $0x318] sm:$0xff] %v2021_v39 }
 0x33c   : > { %v1865_v40 = vpop.f32.mrb[36].mxu0  ;;  %v2025_v41 = vpop.f32.mrb[36].mxu1 }
 0x33d   : > { %2130 = vst [vmem:[%s3441_s5 + $0x120] sm:$0xff] %v1865_v40  ;;  %2194 = vst [vmem:[%s3441_s5 + $0x320] sm:$0xff] %v2025_v41  ;;  %v1867_v42 = vpop.f32.mrb[37].mxu0  ;;  %v2027_v43 = vpop.f32.mrb[37].mxu1 }
 0x33e   : > { %2131 = vst [vmem:[%s3441_s5 + $0x128] sm:$0xff] %v1867_v42  ;;  %2195 = vst [vmem:[%s3441_s5 + $0x328] sm:$0xff] %v2027_v43  ;;  %v1869_v44 = vpop.f32.mrb[38].mxu0  ;;  %v2029_v45 = vpop.f32.mrb[38].mxu1 }
 0x33f   : > { %2132 = vst [vmem:[%s3441_s5 + $0x130] sm:$0xff] %v1869_v44  ;;  %2196 = vst [vmem:[%s3441_s5 + $0x330] sm:$0xff] %v2029_v45  ;;  %v1871_v46 = vpop.f32.mrb[39].mxu0  ;;  %v2031_v47 = vpop.f32.mrb[39].mxu1 }
 0x340   : > { %2133 = vst [vmem:[%s3441_s5 + $0x138] sm:$0xff] %v1871_v46  ;;  %2197 = vst [vmem:[%s3441_s5 + $0x338] sm:$0xff] %v2031_v47 }
 0x344   : > { %v1875_v48 = vpop.f32.mrb[40].mxu0  ;;  %v2035_v49 = vpop.f32.mrb[40].mxu1 }
 0x345   : > { %2134 = vst [vmem:[%s3441_s5 + $0x140] sm:$0xff] %v1875_v48  ;;  %2198 = vst [vmem:[%s3441_s5 + $0x340] sm:$0xff] %v2035_v49  ;;  %v1877_v50 = vpop.f32.mrb[41].mxu0  ;;  %v2037_v51 = vpop.f32.mrb[41].mxu1 }
 0x346   : > { %2135 = vst [vmem:[%s3441_s5 + $0x148] sm:$0xff] %v1877_v50  ;;  %2199 = vst [vmem:[%s3441_s5 + $0x348] sm:$0xff] %v2037_v51  ;;  %v1879_v52 = vpop.f32.mrb[42].mxu0  ;;  %v2039_v53 = vpop.f32.mrb[42].mxu1 }
 0x347   : > { %2136 = vst [vmem:[%s3441_s5 + $0x150] sm:$0xff] %v1879_v52  ;;  %2200 = vst [vmem:[%s3441_s5 + $0x350] sm:$0xff] %v2039_v53  ;;  %v1881_v54 = vpop.f32.mrb[43].mxu0  ;;  %v2041_v55 = vpop.f32.mrb[43].mxu1 }
 0x348   : > { %2137 = vst [vmem:[%s3441_s5 + $0x158] sm:$0xff] %v1881_v54  ;;  %2201 = vst [vmem:[%s3441_s5 + $0x358] sm:$0xff] %v2041_v55 }
 0x34c   : > { %v1885_v56 = vpop.f32.mrb[44].mxu0  ;;  %v2045_v57 = vpop.f32.mrb[44].mxu1 }
 0x34d   : > { %2138 = vst [vmem:[%s3441_s5 + $0x160] sm:$0xff] %v1885_v56  ;;  %2202 = vst [vmem:[%s3441_s5 + $0x360] sm:$0xff] %v2045_v57  ;;  %v1887_v58 = vpop.f32.mrb[45].mxu0  ;;  %v2047_v59 = vpop.f32.mrb[45].mxu1 }
 0x34e   : > { %2139 = vst [vmem:[%s3441_s5 + $0x168] sm:$0xff] %v1887_v58  ;;  %2203 = vst [vmem:[%s3441_s5 + $0x368] sm:$0xff] %v2047_v59  ;;  %v1889_v60 = vpop.f32.mrb[46].mxu0  ;;  %v2049_v61 = vpop.f32.mrb[46].mxu1 }
 0x34f   : > { %2140 = vst [vmem:[%s3441_s5 + $0x170] sm:$0xff] %v1889_v60  ;;  %2204 = vst [vmem:[%s3441_s5 + $0x370] sm:$0xff] %v2049_v61  ;;  %v1891_v62 = vpop.f32.mrb[47].mxu0  ;;  %v2051_v63 = vpop.f32.mrb[47].mxu1 }
 0x350   : > { %2141 = vst [vmem:[%s3441_s5 + $0x178] sm:$0xff] %v1891_v62  ;;  %2205 = vst [vmem:[%s3441_s5 + $0x378] sm:$0xff] %v2051_v63 }
 0x354   : > { %v1895_v0 = vpop.f32.mrb[48].mxu0  ;;  %v2055_v1 = vpop.f32.mrb[48].mxu1 }
 0x355   : > { %2142 = vst [vmem:[%s3441_s5 + $0x180] sm:$0xff] %v1895_v0  ;;  %2206 = vst [vmem:[%s3441_s5 + $0x380] sm:$0xff] %v2055_v1  ;;  %v1897_v2 = vpop.f32.mrb[49].mxu0  ;;  %v2057_v3 = vpop.f32.mrb[49].mxu1 }
 0x356   : > { %2143 = vst [vmem:[%s3441_s5 + $0x188] sm:$0xff] %v1897_v2  ;;  %2207 = vst [vmem:[%s3441_s5 + $0x388] sm:$0xff] %v2057_v3  ;;  %v1899_v4 = vpop.f32.mrb[50].mxu0  ;;  %v2059_v5 = vpop.f32.mrb[50].mxu1 }
 0x357   : > { %2144 = vst [vmem:[%s3441_s5 + $0x190] sm:$0xff] %v1899_v4  ;;  %2208 = vst [vmem:[%s3441_s5 + $0x390] sm:$0xff] %v2059_v5  ;;  %v1901_v6 = vpop.f32.mrb[51].mxu0  ;;  %v2061_v7 = vpop.f32.mrb[51].mxu1 }
 0x358   : > { %2145 = vst [vmem:[%s3441_s5 + $0x198] sm:$0xff] %v1901_v6  ;;  %2209 = vst [vmem:[%s3441_s5 + $0x398] sm:$0xff] %v2061_v7 }
 0x35c   : > { %v1905_v8 = vpop.f32.mrb[52].mxu0  ;;  %v2065_v9 = vpop.f32.mrb[52].mxu1 }
 0x35d   : > { %2146 = vst [vmem:[%s3441_s5 + $0x1a0] sm:$0xff] %v1905_v8  ;;  %2210 = vst [vmem:[%s3441_s5 + $0x3a0] sm:$0xff] %v2065_v9  ;;  %v1907_v10 = vpop.f32.mrb[53].mxu0  ;;  %v2067_v11 = vpop.f32.mrb[53].mxu1 }
 0x35e   : > { %2147 = vst [vmem:[%s3441_s5 + $0x1a8] sm:$0xff] %v1907_v10  ;;  %2211 = vst [vmem:[%s3441_s5 + $0x3a8] sm:$0xff] %v2067_v11  ;;  %v1909_v12 = vpop.f32.mrb[54].mxu0  ;;  %v2069_v13 = vpop.f32.mrb[54].mxu1 }
 0x35f   : > { %2148 = vst [vmem:[%s3441_s5 + $0x1b0] sm:$0xff] %v1909_v12  ;;  %2212 = vst [vmem:[%s3441_s5 + $0x3b0] sm:$0xff] %v2069_v13  ;;  %v1911_v14 = vpop.f32.mrb[55].mxu0  ;;  %v2071_v15 = vpop.f32.mrb[55].mxu1 }
 0x360   : > { %2149 = vst [vmem:[%s3441_s5 + $0x1b8] sm:$0xff] %v1911_v14  ;;  %2213 = vst [vmem:[%s3441_s5 + $0x3b8] sm:$0xff] %v2071_v15 }
 0x364   : > { %v1915_v16 = vpop.f32.mrb[56].mxu0  ;;  %v2075_v17 = vpop.f32.mrb[56].mxu1 }
 0x365   : > { %2150 = vst [vmem:[%s3441_s5 + $0x1c0] sm:$0xff] %v1915_v16  ;;  %2214 = vst [vmem:[%s3441_s5 + $0x3c0] sm:$0xff] %v2075_v17  ;;  %v1917_v18 = vpop.f32.mrb[57].mxu0  ;;  %v2077_v19 = vpop.f32.mrb[57].mxu1 }
 0x366   : > { %2151 = vst [vmem:[%s3441_s5 + $0x1c8] sm:$0xff] %v1917_v18  ;;  %2215 = vst [vmem:[%s3441_s5 + $0x3c8] sm:$0xff] %v2077_v19  ;;  %v1919_v20 = vpop.f32.mrb[58].mxu0  ;;  %v2079_v21 = vpop.f32.mrb[58].mxu1 }
 0x367   : > { %2152 = vst [vmem:[%s3441_s5 + $0x1d0] sm:$0xff] %v1919_v20  ;;  %2216 = vst [vmem:[%s3441_s5 + $0x3d0] sm:$0xff] %v2079_v21  ;;  %v1921_v22 = vpop.f32.mrb[59].mxu0  ;;  %v2081_v23 = vpop.f32.mrb[59].mxu1 }
 0x368   : > { %2153 = vst [vmem:[%s3441_s5 + $0x1d8] sm:$0xff] %v1921_v22  ;;  %2217 = vst [vmem:[%s3441_s5 + $0x3d8] sm:$0xff] %v2081_v23 }
 0x36c   : > { %v1925_v24 = vpop.f32.mrb[60].mxu0  ;;  %v2085_v25 = vpop.f32.mrb[60].mxu1 }
 0x36d   : > { %2154 = vst [vmem:[%s3441_s5 + $0x1e0] sm:$0xff] %v1925_v24  ;;  %2218 = vst [vmem:[%s3441_s5 + $0x3e0] sm:$0xff] %v2085_v25  ;;  %v1927_v26 = vpop.f32.mrb[61].mxu0  ;;  %v2087_v27 = vpop.f32.mrb[61].mxu1 }
 0x36e   : > { %2155 = vst [vmem:[%s3441_s5 + $0x1e8] sm:$0xff] %v1927_v26  ;;  %2219 = vst [vmem:[%s3441_s5 + $0x3e8] sm:$0xff] %v2087_v27  ;;  %v1929_v28 = vpop.f32.mrb[62].mxu0  ;;  %v2089_v29 = vpop.f32.mrb[62].mxu1 }
 0x36f   : > { %2156 = vst [vmem:[%s3441_s5 + $0x1f0] sm:$0xff] %v1929_v28  ;;  %2220 = vst [vmem:[%s3441_s5 + $0x3f0] sm:$0xff] %v2089_v29  ;;  %v1931_v30 = vpop.f32.mrb[63].mxu0  ;;  %v2091_v31 = vpop.f32.mrb[63].mxu1 }
 0x370   : > { %2157 = vst [vmem:[%s3441_s5 + $0x1f8] sm:$0xff] %v1931_v30  ;;  %2221 = vst [vmem:[%s3441_s5 + $0x3f8] sm:$0xff] %v2091_v31 }
 0x371   : > { %3088 = shalt.err (!%p3085_p4)
}
 0x372   : > { %s3089_s11 = scalar_lea.hbm %s3635_s29, 16384  ;;  %s3093_s21 = scalar_lea.hbm %s3696_s4, 32768 }
 0x373   : > { %p3090_p2 = scmp.ne.s32.totalorder %s3635_s29, %s3089_s11  ;;  %p3094_p1 = scmp.lt.u32.totalorder %s3635_s29, %s3696_s4 }
 0x374   : > { %p3095_p11 = scmp.lt.u32.totalorder %s3093_s21, %s3089_s11  ;;  %p3097_p6 = scmp.lt.u32.totalorder %s3089_s11, %s3635_s29 }
 0x375   : > { %p3091_p8 = pnand %p3090_p2, %p3361_p10 }
 0x376   : > { %p3096_p13 = por %p3095_p11, %p3094_p1 }
 0x377   : > { %p3092_p12 = pneg %p3091_p8 }
 0x378   : > { %p3098_p3 = por %p3097_p6, %p3096_p13 }
 0x37a   : > { %p3099_p5 = pnand %p3098_p3, %p3092_p12 }
 0x37c   : > { %3102 = shalt.err (!%p3099_p5)
}
 0x37d   : > { %s3174_s5 = smov 256   ;;  %s3175_s23 = smov 16  }
 0x37e   : > { %2686 = dma.vmem_to_hbm [thread:$0]  (%p3361_p10), %s3637_s25, 16384, %s3635_s29, %s2223_s18, %s3174_s5, %s3174_s5, %s3175_s23  }
 0x37f PF: > { %s3716_s7 = sld [smem:[#allocation16_spill]]  ;;  %s2254_s24 = sand.u32 1, %s3145_s15  }
 0x380   : > { %p3718_p9 = scmp.ge.s32.totalorder %s3165_s20, 2  ;;  %s2255_s6 = scalar_lea.sflag [#allocation5], %s2254_s24 }
 0x385   : > { %p3717_p7 = scmp.ne.s32.totalorder %s3716_s7, 0 }
 0x387   : > { %p2703_p0 = pnand %p3718_p9, %p3717_p7 }
 0x389   : > { %3140 = dma.done.wait (!%p2703_p0), %s2255_s6, 16384  }
 0x38a   : > { %3142 = vsyncadd (!%p2703_p0), %s2255_s6, 4294950912  ;;  %s22_s20 = sadd.s32 1, %s3165_s20   ;;  %s3719_s15 = smov %s3149_s16 }
 0x38b   : > { %p19_p4 = scmp.ge.s32.totalorder %s22_s20, 4   ;;  %s3720_s16 = smov %s3153_s17 }
 0x38c   : > { %s3721_s17 = smov %s3373_s13  ;;  %s3722_s18 = smov %s3161_s19 }
 0x38d   : > { %s3723_s19 = smov %s3725_s30  ;;  %21 = sbr.rel (!%p19_p4) target bundleno = 8 (0x8), region = 99 }
 0x394   :  { %2260 = vsyncpa [#allocation4], 1 }
 0x395   :  { %2262 = vsyncpa [#allocation4 + $0x1], 1 }
 0x396   :  { %2263 = vsyncpa [#allocation7], 1 }
 0x397   :  { %2264 = vsyncpa [#allocation10], 1 }
 0x398   :  { %2265 = vsyncpa [#allocation5], 1 }
 0x399   :  { %2267 = vsyncpa [#allocation5 + $0x1], 1 }

</bundles_post_ra>
